<compile_context>
chip_gen: v5e
topology: v5e:2x2
jax: 0.10.0
libtpu: 0.0.40
codegen_flags: <defaults>
</compile_context>

<pallas_src>
import functools
from dataclasses import dataclass

import jax
import jax.numpy as jnp
from jax.experimental import pallas as pl
from jax.experimental.pallas import tpu as pltpu

_EPS = 1e-5
_BF16 = jnp.bfloat16


def _vmem_limit_bytes() -> int:
    # ~75% of physical VMEM: v5e/v6e (128 MiB) -> 96 MiB, v7x (64 MiB) -> 48 MiB.
    # Leaves headroom for compiler scratch / double buffers (review: don't set the
    # scoped limit to physical on v7x).
    try:
        cap = int(getattr(pltpu.get_tpu_info(), "vmem_capacity_bytes"))
    except Exception:
        cap = 64 * 1024 * 1024
    return min((cap * 3) // 4, 112 * 1024 * 1024)


_VMEM_LIMIT = _vmem_limit_bytes()


def _seq_tile(s: int) -> int:
    # Large token tiles amortize the ~0.35us per-grid-step overhead (85%+ of HBM
    # roofline at >=512 rows); use the full extent when the sequence is small.
    return s if s <= 512 else 512


def _compiler_params(n_parallel_axes: int):
    return pltpu.CompilerParams(
        dimension_semantics=("parallel",) * n_parallel_axes,
        vmem_limit_bytes=_VMEM_LIMIT,
    )


# ---------------------------------------------------------------------------
# Kernels
# ---------------------------------------------------------------------------
def _layernorm_f32(z, gamma, beta):
    mean = jnp.mean(z, axis=-1, keepdims=True)
    cent = z - mean
    var = jnp.mean(cent * cent, axis=-1, keepdims=True)
    return cent * jax.lax.rsqrt(var + _EPS) * gamma + beta


def _qkv_kernel(x_ref, w_ref, b_ref, o_ref):
    # x: (1, ts, e) f32, w: (e, 3e) bf16 (VMEM resident), b: (1, 3e) f32.
    x = x_ref[0].astype(_BF16)
    y = jnp.dot(x, w_ref[...], preferred_element_type=jnp.float32)
    o_ref[0] = (y + b_ref[...]).astype(o_ref.dtype)


def _attention_kernel(qkv_ref, o_ref, *, num_heads, scale):
    # qkv block: (1, s, 3e) = [Q | K | V], each head-blocked along columns.
    # Output block: (1, s, e) already in PyTorch head-concat order (lane-dense).
    seq = qkv_ref.shape[1]
    e = o_ref.shape[2]
    dh = e // num_heads
    qkv = qkv_ref[0]                                   # (s, 3e) f32
    q_all = qkv[:, :e] * scale                         # fold 1/sqrt(dh) into Q once
    k_all = qkv[:, e:2 * e]
    v_all = qkv[:, 2 * e:]

    row = jax.lax.broadcasted_iota(jnp.int32, (seq, seq), 0)
    col = jax.lax.broadcasted_iota(jnp.int32, (seq, seq), 1)
    causal = col <= row

    outs = []
    for h in range(num_heads):                         # static unroll over heads
        lo, hi = h * dh, (h + 1) * dh
        q = q_all[:, lo:hi].astype(_BF16)
        k = k_all[:, lo:hi].astype(_BF16)
        v = v_all[:, lo:hi].astype(_BF16)
        # q @ k^T without materializing a transpose; f32 accumulation on the MXU.
        s_mat = jax.lax.dot_general(q, k, (((1,), (1,)), ((), ())),
                                    preferred_element_type=jnp.float32)
        s_mat = jnp.where(causal, s_mat, -jnp.inf)     # scores stay f32: -inf is safe
        m = jnp.max(s_mat, axis=-1, keepdims=True)
        p = jnp.exp(s_mat - m)
        denom = jnp.sum(p, axis=-1, keepdims=True)
        p = p * pl.reciprocal(denom, approx=True)      # EUP reciprocal (off the VALU)
        outs.append(jnp.dot(p.astype(_BF16), v, preferred_element_type=jnp.float32))
    # One full-width (lane-dense) store of the concatenated heads.
    o_ref[0] = jnp.concatenate(outs, axis=-1).astype(o_ref.dtype)


def _post_attn_kernel(attn_ref, x_ref, wo_ref, bo_ref, g1_ref, be1_ref,
                      w1_ref, b1_ref, w2_ref, b2_ref, g2_ref, be2_ref, o_ref):
    # Fused epilogue of one decoder layer:
    #   h1  = LayerNorm(x + attn @ Wo + bo)
    #   out = LayerNorm(h1 + ReLU(h1 @ W1 + b1) @ W2 + b2)
    x = x_ref[0].astype(jnp.float32)
    y = jnp.dot(attn_ref[0].astype(_BF16), wo_ref[...],
                preferred_element_type=jnp.float32) + bo_ref[...]
    h1 = _layernorm_f32(x + y, g1_ref[...], be1_ref[...])
    h = jnp.dot(h1.astype(_BF16), w1_ref[...],
                preferred_element_type=jnp.float32) + b1_ref[...]
    h = jnp.maximum(h, 0.0)
    y2 = jnp.dot(h.astype(_BF16), w2_ref[...],
                 preferred_element_type=jnp.float32) + b2_ref[...]
    o_ref[0] = _layernorm_f32(h1 + y2, g2_ref[...], be2_ref[...]).astype(o_ref.dtype)


# ---------------------------------------------------------------------------
# pallas_call wrappers (grid over (batch, token-tile); weights VMEM-resident)
# ---------------------------------------------------------------------------
def qkv_linear(x, w_bf16, b):
    bsz, s, e = x.shape
    n = w_bf16.shape[1]
    ts = _seq_tile(s)
    return pl.pallas_call(
        _qkv_kernel,
        out_shape=jax.ShapeDtypeStruct((bsz, s, n), jnp.float32),
        grid=(bsz, pl.cdiv(s, ts)),
        in_specs=[
            pl.BlockSpec((1, ts, e), lambda bi, ti: (bi, ti, 0)),
            pl.BlockSpec((e, n), lambda bi, ti: (0, 0)),    # weight stays resident
            pl.BlockSpec((1, n), lambda bi, ti: (0, 0)),
        ],
        out_specs=pl.BlockSpec((1, ts, n), lambda bi, ti: (bi, ti, 0)),
        compiler_params=_compiler_params(2),
    )(x, w_bf16, b.reshape(1, n))


def causal_attention(qkv, num_heads, e):
    bsz, s, n3e = qkv.shape
    dh = e // num_heads
    kernel = functools.partial(_attention_kernel, num_heads=num_heads,
                               scale=1.0 / (dh ** 0.5))
    return pl.pallas_call(
        kernel,
        out_shape=jax.ShapeDtypeStruct((bsz, s, e), jnp.float32),
        grid=(bsz,),
        in_specs=[pl.BlockSpec((1, s, n3e), lambda bi: (bi, 0, 0))],
        out_specs=pl.BlockSpec((1, s, e), lambda bi: (bi, 0, 0)),
        compiler_params=_compiler_params(1),
    )(qkv)


def post_attention(attn, x, p_bf, p):
    bsz, s, e = x.shape
    hd = p_bf["w1"].shape[1]
    ts = _seq_tile(s)
    tile = lambda bi, ti: (bi, ti, 0)
    const = lambda bi, ti: (0, 0)
    row = lambda v: v.reshape(1, -1)
    return pl.pallas_call(
        _post_attn_kernel,
        out_shape=jax.ShapeDtypeStruct((bsz, s, e), x.dtype),
        grid=(bsz, pl.cdiv(s, ts)),
        in_specs=[
            pl.BlockSpec((1, ts, e), tile),    # attn (head-concat layout)
            pl.BlockSpec((1, ts, e), tile),    # residual x
            pl.BlockSpec((e, e), const),       # Wo (bf16, resident)
            pl.BlockSpec((1, e), const),       # bo
            pl.BlockSpec((1, e), const),       # ln1 gamma
            pl.BlockSpec((1, e), const),       # ln1 beta
            pl.BlockSpec((e, hd), const),      # W1 (bf16)
            pl.BlockSpec((1, hd), const),      # b1
            pl.BlockSpec((hd, e), const),      # W2 (bf16)
            pl.BlockSpec((1, e), const),       # b2
            pl.BlockSpec((1, e), const),       # ln2 gamma
            pl.BlockSpec((1, e), const),       # ln2 beta
        ],
        out_specs=pl.BlockSpec((1, ts, e), tile),
        compiler_params=_compiler_params(2),
    )(attn, x, p_bf["wo"], row(p["bo"]), row(p["ln1_g"]), row(p["ln1_b"]),
      p_bf["w1"], row(p["b1"]), p_bf["w2"], row(p["b2"]),
      row(p["ln2_g"]), row(p["ln2_b"]))


# ---------------------------------------------------------------------------
# Decoder forward (no wrapper-side transposes / reshapes of activations)
# ---------------------------------------------------------------------------
def decoder_layer(x, p, num_heads):
    _, _, e = x.shape
    # bf16 weight copies for the MXU (f32 master params kept for LN/bias math).
    p_bf = {k: p[k].astype(_BF16) for k in ("wqkv", "wo", "w1", "w2")}
    qkv = qkv_linear(x, p_bf["wqkv"], p["bqkv"])      # (b, s, 3e)
    attn = causal_attention(qkv, num_heads, e)        # (b, s, e), head-concat layout
    return post_attention(attn, x, p_bf, p)           # fused proj+LN+FFN+LN


def transformer_decoder(x, params, num_heads):
    for p in params:
        x = decoder_layer(x, p, num_heads)
    return x


# ---------------------------------------------------------------------------
# Params / reference / demo
# ---------------------------------------------------------------------------
@dataclass
class Config:
    embedding_dim: int = 128      # multiple of 128 -> lane-dense vregs / full vst
    num_heads: int = 4
    hidden_dim: int = 256         # multiple of 128
    num_decoder_layers: int = 2
    residual_drop_prob: float = 0.1   # identity in eval mode


def _linear_init(kw, kb, fan_in, fan_out):
    bound = 1.0 / (fan_in ** 0.5)
    w = jax.random.uniform(kw, (fan_in, fan_out), jnp.float32, -bound, bound)
    b = jax.random.uniform(kb, (fan_out,), jnp.float32, -bound, bound)
    return w, b


def init_layer_params(key, cfg):
    e, hd = cfg.embedding_dim, cfg.hidden_dim
    keys = jax.random.split(key, 8)
    # Fused per-head q/k/v weights; columns laid out [Q | K | V], head-blocked.
    wqkv, bqkv = _linear_init(keys[0], keys[1], e, 3 * e)
    wo, bo = _linear_init(keys[2], keys[3], e, e)
    w1, b1 = _linear_init(keys[4], keys[5], e, hd)
    w2, b2 = _linear_init(keys[6], keys[7], hd, e)
    return dict(
        wqkv=wqkv, bqkv=bqkv, wo=wo, bo=bo,
        ln1_g=jnp.ones((e,), jnp.float32), ln1_b=jnp.zeros((e,), jnp.float32),
        w1=w1, b1=b1, w2=w2, b2=b2,
        ln2_g=jnp.ones((e,), jnp.float32), ln2_b=jnp.zeros((e,), jnp.float32),
    )


def _ref_layernorm(z, g, b):
    mean = jnp.mean(z, axis=-1, keepdims=True)
    var = jnp.mean((z - mean) ** 2, axis=-1, keepdims=True)
    return (z - mean) / jnp.sqrt(var + _EPS) * g + b


def _mm(a, b):
    # Mirrors the kernels' matmul numerics: bf16 operands, f32 accumulation.
    return jnp.dot(a.astype(_BF16), b.astype(_BF16),
                   preferred_element_type=jnp.float32)


def ref_decoder_layer(x, p, num_heads):
    # Pure-JAX golden model (same math as the PyTorch module in eval mode,
    # with the same bf16-matmul / f32-accumulate precision choice as the kernels).
    b, s, e = x.shape
    dh = e // num_heads
    scale = 1.0 / (dh ** 0.5)
    qkv = _mm(x, p["wqkv"]) + p["bqkv"]                      # (b, s, 3e)
    causal = jnp.tril(jnp.ones((s, s), dtype=bool))
    heads = []
    for h in range(num_heads):
        lo, hi = h * dh, (h + 1) * dh
        q = (qkv[..., lo:hi] * scale).astype(_BF16)
        k = qkv[..., e + lo:e + hi].astype(_BF16)
        v = qkv[..., 2 * e + lo:2 * e + hi].astype(_BF16)
        sc = jnp.einsum("bqd,bkd->bqk", q, k, preferred_element_type=jnp.float32)
        sc = jnp.where(causal, sc, -jnp.inf)
        pr = jax.nn.softmax(sc, axis=-1)
        heads.append(jnp.einsum("bqk,bkd->bqd", pr.astype(_BF16), v,
                                preferred_element_type=jnp.float32))
    attn = jnp.concatenate(heads, axis=-1)                   # torch head-concat order
    h1 = _ref_layernorm(x + _mm(attn, p["wo"]) + p["bo"], p["ln1_g"], p["ln1_b"])
    ff = jnp.maximum(_mm(h1, p["w1"]) + p["b1"], 0.0)
    ff = _mm(ff, p["w2"]) + p["b2"]
    return _ref_layernorm(h1 + ff, p["ln2_g"], p["ln2_b"])


def ref_transformer_decoder(x, params, num_heads):
    for p in params:
        x = ref_decoder_layer(x, p, num_heads)
    return x


if __name__ == "__main__":
    cfg = Config()
    batch, seq = 2, 8
    key = jax.random.PRNGKey(0)
    kx, kp = jax.random.split(key)
    x = jax.random.normal(kx, (batch, seq, cfg.embedding_dim), jnp.float32)
    params = [init_layer_params(k, cfg)
              for k in jax.random.split(kp, cfg.num_decoder_layers)]

    fwd = jax.jit(lambda xx, pp: transformer_decoder(xx, pp, cfg.num_heads))
    out = jax.block_until_ready(fwd(x, params))

    ref = jax.block_until_ready(
        jax.jit(lambda xx, pp: ref_transformer_decoder(xx, pp, cfg.num_heads))(x, params))

    assert out.shape == (batch, seq, cfg.embedding_dim)
    max_err = float(jnp.max(jnp.abs(out - ref)))
    assert max_err < 2e-2, f"max abs err = {max_err}"
    print("KERNEL_OK")
</pallas_src>

<mosaic_0001>
module attributes {stable_mosaic.version = 11 : i64} {
  func.func @_qkv_kernel(%arg0: i32, %arg1: i32, %arg2: memref<1x8x128xf32, #tpu.memory_space<vmem>>, %arg3: memref<128x384xbf16, #tpu.memory_space<vmem>>, %arg4: memref<1x384xf32, #tpu.memory_space<vmem>>, %arg5: memref<1x8x384xf32, #tpu.memory_space<vmem>>) attributes {dimension_semantics = [#tpu.dimension_semantics<parallel>, #tpu.dimension_semantics<parallel>], iteration_bounds = array<i64: 2, 1>, scalar_prefetch = 0 : i64, scratch_operands = 0 : i64, tpu.core_type = #tpu.core_type<tc>, window_params = [{transform_indices = @transform_0, window_bounds = array<i64: 1, 8, 128>}, {pipeline_mode = #tpu.pipeline_mode<synchronous>, transform_indices = @transform_1, window_bounds = array<i64: 128, 384>}, {pipeline_mode = #tpu.pipeline_mode<synchronous>, transform_indices = @transform_2, window_bounds = array<i64: 1, 384>}, {transform_indices = @transform_3, window_bounds = array<i64: 1, 8, 384>}]} {
    %c0 = arith.constant 0 : index
    %c0_0 = arith.constant 0 : index
    %c0_1 = arith.constant 0 : index
    %0 = vector.load %arg2[%c0, %c0_0, %c0_1] : memref<1x8x128xf32, #tpu.memory_space<vmem>>, vector<1x8x128xf32>
    %1 = vector.shape_cast %0 : vector<1x8x128xf32> to vector<8x128xf32>
    %2 = arith.truncf %1 : vector<8x128xf32> to vector<8x128xbf16>
    %c0_2 = arith.constant 0 : index
    %c0_3 = arith.constant 0 : index
    %3 = vector.load %arg3[%c0_2, %c0_3] : memref<128x384xbf16, #tpu.memory_space<vmem>>, vector<128x384xbf16>
    %cst = arith.constant dense<0.000000e+00> : vector<8x384xf32>
    %4 = tpu.matmul %2, %3, %cst {dimension_numbers = #tpu.dot_dimension_numbers<[1], [0], [0], [1], [0, 0, 1, 1], [], []>} : vector<8x128xbf16>, vector<128x384xbf16>, vector<8x384xf32> -> vector<8x384xf32>
    %c0_4 = arith.constant 0 : index
    %c0_5 = arith.constant 0 : index
    %5 = vector.load %arg4[%c0_4, %c0_5] : memref<1x384xf32, #tpu.memory_space<vmem>>, vector<1x384xf32>
    %6 = vector.broadcast %5 : vector<1x384xf32> to vector<8x384xf32>
    %7 = arith.addf %4, %6 : vector<8x384xf32>
    %c0_6 = arith.constant 0 : index
    %c0_7 = arith.constant 0 : index
    %c0_8 = arith.constant 0 : index
    %8 = vector.load %arg5[%c0_6, %c0_7, %c0_8] : memref<1x8x384xf32, #tpu.memory_space<vmem>>, vector<1x8x384xf32>
    %9 = vector.shape_cast %8 : vector<1x8x384xf32> to vector<8x384xf32>
    %10 = vector.shape_cast %7 : vector<8x384xf32> to vector<1x8x384xf32>
    tpu.vector_store %arg5[%c0_6, %c0_7, %c0_8], %10 {strides = array<i32>} : memref<1x8x384xf32, #tpu.memory_space<vmem>>, vector<1x8x384xf32>,
    return
  }
  func.func @transform_0(%arg0: i32, %arg1: i32) -> (i32, i32, i32) {
    %c0_i32 = arith.constant 0 : i32
    %c0_i32_0 = arith.constant 0 : i32
    return %arg0, %arg1, %c0_i32 : i32, i32, i32
  }
  func.func @transform_1(%arg0: i32, %arg1: i32) -> (i32, i32) {
    %c0_i32 = arith.constant 0 : i32
    %c0_i32_0 = arith.constant 0 : i32
    %c0_i32_1 = arith.constant 0 : i32
    return %c0_i32, %c0_i32_0 : i32, i32
  }
  func.func @transform_2(%arg0: i32, %arg1: i32) -> (i32, i32) {
    %c0_i32 = arith.constant 0 : i32
    %c0_i32_0 = arith.constant 0 : i32
    %c0_i32_1 = arith.constant 0 : i32
    return %c0_i32, %c0_i32_0 : i32, i32
  }
  func.func @transform_3(%arg0: i32, %arg1: i32) -> (i32, i32, i32) {
    %c0_i32 = arith.constant 0 : i32
    %c0_i32_0 = arith.constant 0 : i32
    return %arg0, %arg1, %c0_i32 : i32, i32, i32
  }
}

module attributes {stable_mosaic.version = 11 : i64} {
  func.func @_attention_kernel(%arg0: i32, %arg1: memref<1x8x384xf32, #tpu.memory_space<vmem>>, %arg2: memref<1x8x128xf32, #tpu.memory_space<vmem>>) attributes {dimension_semantics = [#tpu.dimension_semantics<parallel>], iteration_bounds = array<i64: 2>, scalar_prefetch = 0 : i64, scratch_operands = 0 : i64, tpu.core_type = #tpu.core_type<tc>, window_params = [{transform_indices = @transform_0, window_bounds = array<i64: 1, 8, 384>}, {transform_indices = @transform_1, window_bounds = array<i64: 1, 8, 128>}]} {
    %c0 = arith.constant 0 : index
    %c0_0 = arith.constant 0 : index
    %c0_1 = arith.constant 0 : index
    %0 = vector.load %arg1[%c0, %c0_0, %c0_1] : memref<1x8x384xf32, #tpu.memory_space<vmem>>, vector<1x8x384xf32>
    %1 = vector.shape_cast %0 : vector<1x8x384xf32> to vector<8x384xf32>
    %2 = vector.extract_strided_slice %1 {offsets = [0, 0], sizes = [8, 128], strides = [1, 1]} : vector<8x384xf32> to vector<8x128xf32>
    %cst = arith.constant 0.176776692 : f32
    %3 = vector.broadcast %cst : f32 to vector<8x128xf32>
    %4 = arith.mulf %2, %3 : vector<8x128xf32>
    %5 = vector.extract_strided_slice %1 {offsets = [0, 128], sizes = [8, 128], strides = [1, 1]} : vector<8x384xf32> to vector<8x128xf32>
    %6 = vector.extract_strided_slice %1 {offsets = [0, 256], sizes = [8, 128], strides = [1, 1]} : vector<8x384xf32> to vector<8x128xf32>
    %7 = tpu.iota {dimensions = array<i32: 0>} : vector<8x8xi32>
    %8 = tpu.iota {dimensions = array<i32: 1>} : vector<8x8xi32>
    %9 = arith.cmpi sle, %8, %7 : vector<8x8xi32>
    %10 = vector.extract_strided_slice %4 {offsets = [0, 0], sizes = [8, 32], strides = [1, 1]} : vector<8x128xf32> to vector<8x32xf32>
    %11 = arith.truncf %10 : vector<8x32xf32> to vector<8x32xbf16>
    %12 = vector.extract_strided_slice %5 {offsets = [0, 0], sizes = [8, 32], strides = [1, 1]} : vector<8x128xf32> to vector<8x32xf32>
    %13 = arith.truncf %12 : vector<8x32xf32> to vector<8x32xbf16>
    %14 = vector.extract_strided_slice %6 {offsets = [0, 0], sizes = [8, 32], strides = [1, 1]} : vector<8x128xf32> to vector<8x32xf32>
    %15 = arith.truncf %14 : vector<8x32xf32> to vector<8x32xbf16>
    %cst_2 = arith.constant dense<0.000000e+00> : vector<8x8xf32>
    %16 = tpu.matmul %11, %13, %cst_2 {dimension_numbers = #tpu.dot_dimension_numbers<[1], [1], [0], [0], [0, 0, 1, 0], [], []>} : vector<8x32xbf16>, vector<8x32xbf16>, vector<8x8xf32> -> vector<8x8xf32>
    %cst_3 = arith.constant 0xFF800000 : f32
    %17 = vector.broadcast %cst_3 : f32 to vector<8x8xf32>
    %18 = arith.select %9, %16, %17 : vector<8x8xi1>, vector<8x8xf32>
    %cst_4 = arith.constant dense<0xFF800000> : vector<8xf32>
    %19 = vector.multi_reduction <maximumf>, %18, %cst_4 [1] : vector<8x8xf32> to vector<8xf32>
    %20 = vector.shape_cast %19 : vector<8xf32> to vector<8x1xf32>
    %21 = vector.broadcast %20 : vector<8x1xf32> to vector<8x8xf32>
    %22 = arith.subf %18, %21 : vector<8x8xf32>
    %23 = math.exp %22 : vector<8x8xf32>
    %cst_5 = arith.constant dense<0.000000e+00> : vector<8xf32>
    %24 = vector.multi_reduction <add>, %23, %cst_5 [1] : vector<8x8xf32> to vector<8xf32>
    %25 = vector.shape_cast %24 : vector<8xf32> to vector<8x1xf32>
    %26 = tpu.reciprocal %25 {approx = true} : vector<8x1xf32> -> vector<8x1xf32>
    %27 = vector.broadcast %26 : vector<8x1xf32> to vector<8x8xf32>
    %28 = arith.mulf %23, %27 : vector<8x8xf32>
    %29 = arith.truncf %28 : vector<8x8xf32> to vector<8x8xbf16>
    %cst_6 = arith.constant dense<0.000000e+00> : vector<8x32xf32>
    %30 = tpu.matmul %29, %15, %cst_6 {dimension_numbers = #tpu.dot_dimension_numbers<[1], [0], [0], [1], [0, 0, 1, 1], [], []>} : vector<8x8xbf16>, vector<8x32xbf16>, vector<8x32xf32> -> vector<8x32xf32>
    %31 = vector.extract_strided_slice %4 {offsets = [0, 32], sizes = [8, 32], strides = [1, 1]} : vector<8x128xf32> to vector<8x32xf32>
    %32 = arith.truncf %31 : vector<8x32xf32> to vector<8x32xbf16>
    %33 = vector.extract_strided_slice %5 {offsets = [0, 32], sizes = [8, 32], strides = [1, 1]} : vector<8x128xf32> to vector<8x32xf32>
    %34 = arith.truncf %33 : vector<8x32xf32> to vector<8x32xbf16>
    %35 = vector.extract_strided_slice %6 {offsets = [0, 32], sizes = [8, 32], strides = [1, 1]} : vector<8x128xf32> to vector<8x32xf32>
    %36 = arith.truncf %35 : vector<8x32xf32> to vector<8x32xbf16>
    %cst_7 = arith.constant dense<0.000000e+00> : vector<8x8xf32>
    %37 = tpu.matmul %32, %34, %cst_7 {dimension_numbers = #tpu.dot_dimension_numbers<[1], [1], [0], [0], [0, 0, 1, 0], [], []>} : vector<8x32xbf16>, vector<8x32xbf16>, vector<8x8xf32> -> vector<8x8xf32>
    %cst_8 = arith.constant 0xFF800000 : f32
    %38 = vector.broadcast %cst_8 : f32 to vector<8x8xf32>
    %39 = arith.select %9, %37, %38 : vector<8x8xi1>, vector<8x8xf32>
    %cst_9 = arith.constant dense<0xFF800000> : vector<8xf32>
    %40 = vector.multi_reduction <maximumf>, %39, %cst_9 [1] : vector<8x8xf32> to vector<8xf32>
    %41 = vector.shape_cast %40 : vector<8xf32> to vector<8x1xf32>
    %42 = vector.broadcast %41 : vector<8x1xf32> to vector<8x8xf32>
    %43 = arith.subf %39, %42 : vector<8x8xf32>
    %44 = math.exp %43 : vector<8x8xf32>
    %cst_10 = arith.constant dense<0.000000e+00> : vector<8xf32>
    %45 = vector.multi_reduction <add>, %44, %cst_10 [1] : vector<8x8xf32> to vector<8xf32>
    %46 = vector.shape_cast %45 : vector<8xf32> to vector<8x1xf32>
    %47 = tpu.reciprocal %46 {approx = true} : vector<8x1xf32> -> vector<8x1xf32>
    %48 = vector.broadcast %47 : vector<8x1xf32> to vector<8x8xf32>
    %49 = arith.mulf %44, %48 : vector<8x8xf32>
    %50 = arith.truncf %49 : vector<8x8xf32> to vector<8x8xbf16>
    %cst_11 = arith.constant dense<0.000000e+00> : vector<8x32xf32>
    %51 = tpu.matmul %50, %36, %cst_11 {dimension_numbers = #tpu.dot_dimension_numbers<[1], [0], [0], [1], [0, 0, 1, 1], [], []>} : vector<8x8xbf16>, vector<8x32xbf16>, vector<8x32xf32> -> vector<8x32xf32>
    %52 = vector.extract_strided_slice %4 {offsets = [0, 64], sizes = [8, 32], strides = [1, 1]} : vector<8x128xf32> to vector<8x32xf32>
    %53 = arith.truncf %52 : vector<8x32xf32> to vector<8x32xbf16>
    %54 = vector.extract_strided_slice %5 {offsets = [0, 64], sizes = [8, 32], strides = [1, 1]} : vector<8x128xf32> to vector<8x32xf32>
    %55 = arith.truncf %54 : vector<8x32xf32> to vector<8x32xbf16>
    %56 = vector.extract_strided_slice %6 {offsets = [0, 64], sizes = [8, 32], strides = [1, 1]} : vector<8x128xf32> to vector<8x32xf32>
    %57 = arith.truncf %56 : vector<8x32xf32> to vector<8x32xbf16>
    %cst_12 = arith.constant dense<0.000000e+00> : vector<8x8xf32>
    %58 = tpu.matmul %53, %55, %cst_12 {dimension_numbers = #tpu.dot_dimension_numbers<[1], [1], [0], [0], [0, 0, 1, 0], [], []>} : vector<8x32xbf16>, vector<8x32xbf16>, vector<8x8xf32> -> vector<8x8xf32>
    %cst_13 = arith.constant 0xFF800000 : f32
    %59 = vector.broadcast %cst_13 : f32 to vector<8x8xf32>
    %60 = arith.select %9, %58, %59 : vector<8x8xi1>, vector<8x8xf32>
    %cst_14 = arith.constant dense<0xFF800000> : vector<8xf32>
    %61 = vector.multi_reduction <maximumf>, %60, %cst_14 [1] : vector<8x8xf32> to vector<8xf32>
    %62 = vector.shape_cast %61 : vector<8xf32> to vector<8x1xf32>
    %63 = vector.broadcast %62 : vector<8x1xf32> to vector<8x8xf32>
    %64 = arith.subf %60, %63 : vector<8x8xf32>
    %65 = math.exp %64 : vector<8x8xf32>
    %cst_15 = arith.constant dense<0.000000e+00> : vector<8xf32>
    %66 = vector.multi_reduction <add>, %65, %cst_15 [1] : vector<8x8xf32> to vector<8xf32>
    %67 = vector.shape_cast %66 : vector<8xf32> to vector<8x1xf32>
    %68 = tpu.reciprocal %67 {approx = true} : vector<8x1xf32> -> vector<8x1xf32>
    %69 = vector.broadcast %68 : vector<8x1xf32> to vector<8x8xf32>
    %70 = arith.mulf %65, %69 : vector<8x8xf32>
    %71 = arith.truncf %70 : vector<8x8xf32> to vector<8x8xbf16>
    %cst_16 = arith.constant dense<0.000000e+00> : vector<8x32xf32>
    %72 = tpu.matmul %71, %57, %cst_16 {dimension_numbers = #tpu.dot_dimension_numbers<[1], [0], [0], [1], [0, 0, 1, 1], [], []>} : vector<8x8xbf16>, vector<8x32xbf16>, vector<8x32xf32> -> vector<8x32xf32>
    %73 = vector.extract_strided_slice %4 {offsets = [0, 96], sizes = [8, 32], strides = [1, 1]} : vector<8x128xf32> to vector<8x32xf32>
    %74 = arith.truncf %73 : vector<8x32xf32> to vector<8x32xbf16>
    %75 = vector.extract_strided_slice %5 {offsets = [0, 96], sizes = [8, 32], strides = [1, 1]} : vector<8x128xf32> to vector<8x32xf32>
    %76 = arith.truncf %75 : vector<8x32xf32> to vector<8x32xbf16>
    %77 = vector.extract_strided_slice %6 {offsets = [0, 96], sizes = [8, 32], strides = [1, 1]} : vector<8x128xf32> to vector<8x32xf32>
    %78 = arith.truncf %77 : vector<8x32xf32> to vector<8x32xbf16>
    %cst_17 = arith.constant dense<0.000000e+00> : vector<8x8xf32>
    %79 = tpu.matmul %74, %76, %cst_17 {dimension_numbers = #tpu.dot_dimension_numbers<[1], [1], [0], [0], [0, 0, 1, 0], [], []>} : vector<8x32xbf16>, vector<8x32xbf16>, vector<8x8xf32> -> vector<8x8xf32>
    %cst_18 = arith.constant 0xFF800000 : f32
    %80 = vector.broadcast %cst_18 : f32 to vector<8x8xf32>
    %81 = arith.select %9, %79, %80 : vector<8x8xi1>, vector<8x8xf32>
    %cst_19 = arith.constant dense<0xFF800000> : vector<8xf32>
    %82 = vector.multi_reduction <maximumf>, %81, %cst_19 [1] : vector<8x8xf32> to vector<8xf32>
    %83 = vector.shape_cast %82 : vector<8xf32> to vector<8x1xf32>
    %84 = vector.broadcast %83 : vector<8x1xf32> to vector<8x8xf32>
    %85 = arith.subf %81, %84 : vector<8x8xf32>
    %86 = math.exp %85 : vector<8x8xf32>
    %cst_20 = arith.constant dense<0.000000e+00> : vector<8xf32>
    %87 = vector.multi_reduction <add>, %86, %cst_20 [1] : vector<8x8xf32> to vector<8xf32>
    %88 = vector.shape_cast %87 : vector<8xf32> to vector<8x1xf32>
    %89 = tpu.reciprocal %88 {approx = true} : vector<8x1xf32> -> vector<8x1xf32>
    %90 = vector.broadcast %89 : vector<8x1xf32> to vector<8x8xf32>
    %91 = arith.mulf %86, %90 : vector<8x8xf32>
    %92 = arith.truncf %91 : vector<8x8xf32> to vector<8x8xbf16>
    %cst_21 = arith.constant dense<0.000000e+00> : vector<8x32xf32>
    %93 = tpu.matmul %92, %78, %cst_21 {dimension_numbers = #tpu.dot_dimension_numbers<[1], [0], [0], [1], [0, 0, 1, 1], [], []>} : vector<8x8xbf16>, vector<8x32xbf16>, vector<8x32xf32> -> vector<8x32xf32>
    %94 = tpu.concatenate %30, %51, %72, %93 in 1 : vector<8x32xf32>, vector<8x32xf32>, vector<8x32xf32>, vector<8x32xf32> -> vector<8x128xf32>
    %c0_22 = arith.constant 0 : index
    %c0_23 = arith.constant 0 : index
    %c0_24 = arith.constant 0 : index
    %95 = vector.load %arg2[%c0_22, %c0_23, %c0_24] : memref<1x8x128xf32, #tpu.memory_space<vmem>>, vector<1x8x128xf32>
    %96 = vector.shape_cast %95 : vector<1x8x128xf32> to vector<8x128xf32>
    %97 = vector.shape_cast %94 : vector<8x128xf32> to vector<1x8x128xf32>
    tpu.vector_store %arg2[%c0_22, %c0_23, %c0_24], %97 {strides = array<i32>} : memref<1x8x128xf32, #tpu.memory_space<vmem>>, vector<1x8x128xf32>,
    return
  }
  func.func @transform_0(%arg0: i32) -> (i32, i32, i32) {
    %c0_i32 = arith.constant 0 : i32
    %c0_i32_0 = arith.constant 0 : i32
    %c0_i32_1 = arith.constant 0 : i32
    return %arg0, %c0_i32, %c0_i32_0 : i32, i32, i32
  }
  func.func @transform_1(%arg0: i32) -> (i32, i32, i32) {
    %c0_i32 = arith.constant 0 : i32
    %c0_i32_0 = arith.constant 0 : i32
    %c0_i32_1 = arith.constant 0 : i32
    return %arg0, %c0_i32, %c0_i32_0 : i32, i32, i32
  }
}

module attributes {stable_mosaic.version = 11 : i64} {
  func.func @_post_attn_kernel(%arg0: i32, %arg1: i32, %arg2: memref<1x8x128xf32, #tpu.memory_space<vmem>>, %arg3: memref<1x8x128xf32, #tpu.memory_space<vmem>>, %arg4: memref<128x128xbf16, #tpu.memory_space<vmem>>, %arg5: memref<1x128xf32, #tpu.memory_space<vmem>>, %arg6: memref<1x128xf32, #tpu.memory_space<vmem>>, %arg7: memref<1x128xf32, #tpu.memory_space<vmem>>, %arg8: memref<128x256xbf16, #tpu.memory_space<vmem>>, %arg9: memref<1x256xf32, #tpu.memory_space<vmem>>, %arg10: memref<256x128xbf16, #tpu.memory_space<vmem>>, %arg11: memref<1x128xf32, #tpu.memory_space<vmem>>, %arg12: memref<1x128xf32, #tpu.memory_space<vmem>>, %arg13: memref<1x128xf32, #tpu.memory_space<vmem>>, %arg14: memref<1x8x128xf32, #tpu.memory_space<vmem>>) attributes {dimension_semantics = [#tpu.dimension_semantics<parallel>, #tpu.dimension_semantics<parallel>], iteration_bounds = array<i64: 2, 1>, scalar_prefetch = 0 : i64, scratch_operands = 0 : i64, tpu.core_type = #tpu.core_type<tc>, window_params = [{transform_indices = @transform_0, window_bounds = array<i64: 1, 8, 128>}, {transform_indices = @transform_1, window_bounds = array<i64: 1, 8, 128>}, {pipeline_mode = #tpu.pipeline_mode<synchronous>, transform_indices = @transform_2, window_bounds = array<i64: 128, 128>}, {pipeline_mode = #tpu.pipeline_mode<synchronous>, transform_indices = @transform_3, window_bounds = array<i64: 1, 128>}, {pipeline_mode = #tpu.pipeline_mode<synchronous>, transform_indices = @transform_4, window_bounds = array<i64: 1, 128>}, {pipeline_mode = #tpu.pipeline_mode<synchronous>, transform_indices = @transform_5, window_bounds = array<i64: 1, 128>}, {pipeline_mode = #tpu.pipeline_mode<synchronous>, transform_indices = @transform_6, window_bounds = array<i64: 128, 256>}, {pipeline_mode = #tpu.pipeline_mode<synchronous>, transform_indices = @transform_7, window_bounds = array<i64: 1, 256>}, {pipeline_mode = #tpu.pipeline_mode<synchronous>, transform_indices = @transform_8, window_bounds = array<i64: 256, 128>}, {pipeline_mode = #tpu.pipeline_mode<synchronous>, transform_indices = @transform_9, window_bounds = array<i64: 1, 128>}, {pipeline_mode = #tpu.pipeline_mode<synchronous>, transform_indices = @transform_10, window_bounds = array<i64: 1, 128>}, {pipeline_mode = #tpu.pipeline_mode<synchronous>, transform_indices = @transform_11, window_bounds = array<i64: 1, 128>}, {transform_indices = @transform_12, window_bounds = array<i64: 1, 8, 128>}]} {
    %c0 = arith.constant 0 : index
    %c0_0 = arith.constant 0 : index
    %c0_1 = arith.constant 0 : index
    %0 = vector.load %arg3[%c0, %c0_0, %c0_1] : memref<1x8x128xf32, #tpu.memory_space<vmem>>, vector<1x8x128xf32>
    %1 = vector.shape_cast %0 : vector<1x8x128xf32> to vector<8x128xf32>
    %c0_2 = arith.constant 0 : index
    %c0_3 = arith.constant 0 : index
    %c0_4 = arith.constant 0 : index
    %2 = vector.load %arg2[%c0_2, %c0_3, %c0_4] : memref<1x8x128xf32, #tpu.memory_space<vmem>>, vector<1x8x128xf32>
    %3 = vector.shape_cast %2 : vector<1x8x128xf32> to vector<8x128xf32>
    %4 = arith.truncf %3 : vector<8x128xf32> to vector<8x128xbf16>
    %c0_5 = arith.constant 0 : index
    %c0_6 = arith.constant 0 : index
    %5 = vector.load %arg4[%c0_5, %c0_6] : memref<128x128xbf16, #tpu.memory_space<vmem>>, vector<128x128xbf16>
    %cst = arith.constant dense<0.000000e+00> : vector<8x128xf32>
    %6 = tpu.matmul %4, %5, %cst {dimension_numbers = #tpu.dot_dimension_numbers<[1], [0], [0], [1], [0, 0, 1, 1], [], []>} : vector<8x128xbf16>, vector<128x128xbf16>, vector<8x128xf32> -> vector<8x128xf32>
    %c0_7 = arith.constant 0 : index
    %c0_8 = arith.constant 0 : index
    %7 = vector.load %arg5[%c0_7, %c0_8] : memref<1x128xf32, #tpu.memory_space<vmem>>, vector<1x128xf32>
    %8 = vector.broadcast %7 : vector<1x128xf32> to vector<8x128xf32>
    %9 = arith.addf %6, %8 : vector<8x128xf32>
    %10 = arith.addf %1, %9 : vector<8x128xf32>
    %c0_9 = arith.constant 0 : index
    %c0_10 = arith.constant 0 : index
    %11 = vector.load %arg6[%c0_9, %c0_10] : memref<1x128xf32, #tpu.memory_space<vmem>>, vector<1x128xf32>
    %c0_11 = arith.constant 0 : index
    %c0_12 = arith.constant 0 : index
    %12 = vector.load %arg7[%c0_11, %c0_12] : memref<1x128xf32, #tpu.memory_space<vmem>>, vector<1x128xf32>
    %cst_13 = arith.constant dense<0.000000e+00> : vector<8xf32>
    %13 = vector.multi_reduction <add>, %10, %cst_13 [1] : vector<8x128xf32> to vector<8xf32>
    %14 = vector.shape_cast %13 : vector<8xf32> to vector<8x1xf32>
    %cst_14 = arith.constant 1.280000e+02 : f32
    %15 = vector.broadcast %cst_14 : f32 to vector<8x1xf32>
    %16 = arith.divf %14, %15 : vector<8x1xf32>
    %17 = vector.broadcast %16 : vector<8x1xf32> to vector<8x128xf32>
    %18 = arith.subf %10, %17 : vector<8x128xf32>
    %19 = arith.mulf %18, %18 : vector<8x128xf32>
    %cst_15 = arith.constant dense<0.000000e+00> : vector<8xf32>
    %20 = vector.multi_reduction <add>, %19, %cst_15 [1] : vector<8x128xf32> to vector<8xf32>
    %21 = vector.shape_cast %20 : vector<8xf32> to vector<8x1xf32>
    %cst_16 = arith.constant 1.280000e+02 : f32
    %22 = vector.broadcast %cst_16 : f32 to vector<8x1xf32>
    %23 = arith.divf %21, %22 : vector<8x1xf32>
    %cst_17 = arith.constant 9.99999974E-6 : f32
    %24 = vector.broadcast %cst_17 : f32 to vector<8x1xf32>
    %25 = arith.addf %23, %24 : vector<8x1xf32>
    %26 = math.rsqrt %25 : vector<8x1xf32>
    %27 = vector.broadcast %26 : vector<8x1xf32> to vector<8x128xf32>
    %28 = arith.mulf %18, %27 : vector<8x128xf32>
    %29 = vector.broadcast %11 : vector<1x128xf32> to vector<8x128xf32>
    %30 = arith.mulf %28, %29 : vector<8x128xf32>
    %31 = vector.broadcast %12 : vector<1x128xf32> to vector<8x128xf32>
    %32 = arith.addf %30, %31 : vector<8x128xf32>
    %33 = arith.truncf %32 : vector<8x128xf32> to vector<8x128xbf16>
    %c0_18 = arith.constant 0 : index
    %c0_19 = arith.constant 0 : index
    %34 = vector.load %arg8[%c0_18, %c0_19] : memref<128x256xbf16, #tpu.memory_space<vmem>>, vector<128x256xbf16>
    %cst_20 = arith.constant dense<0.000000e+00> : vector<8x256xf32>
    %35 = tpu.matmul %33, %34, %cst_20 {dimension_numbers = #tpu.dot_dimension_numbers<[1], [0], [0], [1], [0, 0, 1, 1], [], []>} : vector<8x128xbf16>, vector<128x256xbf16>, vector<8x256xf32> -> vector<8x256xf32>
    %c0_21 = arith.constant 0 : index
    %c0_22 = arith.constant 0 : index
    %36 = vector.load %arg9[%c0_21, %c0_22] : memref<1x256xf32, #tpu.memory_space<vmem>>, vector<1x256xf32>
    %37 = vector.broadcast %36 : vector<1x256xf32> to vector<8x256xf32>
    %38 = arith.addf %35, %37 : vector<8x256xf32>
    %cst_23 = arith.constant 0.000000e+00 : f32
    %39 = vector.broadcast %cst_23 : f32 to vector<8x256xf32>
    %40 = arith.maximumf %38, %39 : vector<8x256xf32>
    %41 = arith.truncf %40 : vector<8x256xf32> to vector<8x256xbf16>
    %c0_24 = arith.constant 0 : index
    %c0_25 = arith.constant 0 : index
    %42 = vector.load %arg10[%c0_24, %c0_25] : memref<256x128xbf16, #tpu.memory_space<vmem>>, vector<256x128xbf16>
    %cst_26 = arith.constant dense<0.000000e+00> : vector<8x128xf32>
    %43 = tpu.matmul %41, %42, %cst_26 {dimension_numbers = #tpu.dot_dimension_numbers<[1], [0], [0], [1], [0, 0, 1, 1], [], []>} : vector<8x256xbf16>, vector<256x128xbf16>, vector<8x128xf32> -> vector<8x128xf32>
    %c0_27 = arith.constant 0 : index
    %c0_28 = arith.constant 0 : index
    %44 = vector.load %arg11[%c0_27, %c0_28] : memref<1x128xf32, #tpu.memory_space<vmem>>, vector<1x128xf32>
    %45 = vector.broadcast %44 : vector<1x128xf32> to vector<8x128xf32>
    %46 = arith.addf %43, %45 : vector<8x128xf32>
    %47 = arith.addf %32, %46 : vector<8x128xf32>
    %c0_29 = arith.constant 0 : index
    %c0_30 = arith.constant 0 : index
    %48 = vector.load %arg12[%c0_29, %c0_30] : memref<1x128xf32, #tpu.memory_space<vmem>>, vector<1x128xf32>
    %c0_31 = arith.constant 0 : index
    %c0_32 = arith.constant 0 : index
    %49 = vector.load %arg13[%c0_31, %c0_32] : memref<1x128xf32, #tpu.memory_space<vmem>>, vector<1x128xf32>
    %cst_33 = arith.constant dense<0.000000e+00> : vector<8xf32>
    %50 = vector.multi_reduction <add>, %47, %cst_33 [1] : vector<8x128xf32> to vector<8xf32>
    %51 = vector.shape_cast %50 : vector<8xf32> to vector<8x1xf32>
    %cst_34 = arith.constant 1.280000e+02 : f32
    %52 = vector.broadcast %cst_34 : f32 to vector<8x1xf32>
    %53 = arith.divf %51, %52 : vector<8x1xf32>
    %54 = vector.broadcast %53 : vector<8x1xf32> to vector<8x128xf32>
    %55 = arith.subf %47, %54 : vector<8x128xf32>
    %56 = arith.mulf %55, %55 : vector<8x128xf32>
    %cst_35 = arith.constant dense<0.000000e+00> : vector<8xf32>
    %57 = vector.multi_reduction <add>, %56, %cst_35 [1] : vector<8x128xf32> to vector<8xf32>
    %58 = vector.shape_cast %57 : vector<8xf32> to vector<8x1xf32>
    %cst_36 = arith.constant 1.280000e+02 : f32
    %59 = vector.broadcast %cst_36 : f32 to vector<8x1xf32>
    %60 = arith.divf %58, %59 : vector<8x1xf32>
    %cst_37 = arith.constant 9.99999974E-6 : f32
    %61 = vector.broadcast %cst_37 : f32 to vector<8x1xf32>
    %62 = arith.addf %60, %61 : vector<8x1xf32>
    %63 = math.rsqrt %62 : vector<8x1xf32>
    %64 = vector.broadcast %63 : vector<8x1xf32> to vector<8x128xf32>
    %65 = arith.mulf %55, %64 : vector<8x128xf32>
    %66 = vector.broadcast %48 : vector<1x128xf32> to vector<8x128xf32>
    %67 = arith.mulf %65, %66 : vector<8x128xf32>
    %68 = vector.broadcast %49 : vector<1x128xf32> to vector<8x128xf32>
    %69 = arith.addf %67, %68 : vector<8x128xf32>
    %c0_38 = arith.constant 0 : index
    %c0_39 = arith.constant 0 : index
    %c0_40 = arith.constant 0 : index
    %70 = vector.load %arg14[%c0_38, %c0_39, %c0_40] : memref<1x8x128xf32, #tpu.memory_space<vmem>>, vector<1x8x128xf32>
    %71 = vector.shape_cast %70 : vector<1x8x128xf32> to vector<8x128xf32>
    %72 = vector.shape_cast %69 : vector<8x128xf32> to vector<1x8x128xf32>
    tpu.vector_store %arg14[%c0_38, %c0_39, %c0_40], %72 {strides = array<i32>} : memref<1x8x128xf32, #tpu.memory_space<vmem>>, vector<1x8x128xf32>,
    return
  }
  func.func @transform_0(%arg0: i32, %arg1: i32) -> (i32, i32, i32) {
    %c0_i32 = arith.constant 0 : i32
    %c0_i32_0 = arith.constant 0 : i32
    return %arg0, %arg1, %c0_i32 : i32, i32, i32
  }
  func.func @transform_1(%arg0: i32, %arg1: i32) -> (i32, i32, i32) {
    %c0_i32 = arith.constant 0 : i32
    %c0_i32_0 = arith.constant 0 : i32
    return %arg0, %arg1, %c0_i32 : i32, i32, i32
  }
  func.func @transform_2(%arg0: i32, %arg1: i32) -> (i32, i32) {
    %c0_i32 = arith.constant 0 : i32
    %c0_i32_0 = arith.constant 0 : i32
    %c0_i32_1 = arith.constant 0 : i32
    return %c0_i32, %c0_i32_0 : i32, i32
  }
  func.func @transform_3(%arg0: i32, %arg1: i32) -> (i32, i32) {
    %c0_i32 = arith.constant 0 : i32
    %c0_i32_0 = arith.constant 0 : i32
    %c0_i32_1 = arith.constant 0 : i32
    return %c0_i32, %c0_i32_0 : i32, i32
  }
  func.func @transform_4(%arg0: i32, %arg1: i32) -> (i32, i32) {
    %c0_i32 = arith.constant 0 : i32
    %c0_i32_0 = arith.constant 0 : i32
    %c0_i32_1 = arith.constant 0 : i32
    return %c0_i32, %c0_i32_0 : i32, i32
  }
  func.func @transform_5(%arg0: i32, %arg1: i32) -> (i32, i32) {
    %c0_i32 = arith.constant 0 : i32
    %c0_i32_0 = arith.constant 0 : i32
    %c0_i32_1 = arith.constant 0 : i32
    return %c0_i32, %c0_i32_0 : i32, i32
  }
  func.func @transform_6(%arg0: i32, %arg1: i32) -> (i32, i32) {
    %c0_i32 = arith.constant 0 : i32
    %c0_i32_0 = arith.constant 0 : i32
    %c0_i32_1 = arith.constant 0 : i32
    return %c0_i32, %c0_i32_0 : i32, i32
  }
  func.func @transform_7(%arg0: i32, %arg1: i32) -> (i32, i32) {
    %c0_i32 = arith.constant 0 : i32
    %c0_i32_0 = arith.constant 0 : i32
    %c0_i32_1 = arith.constant 0 : i32
    return %c0_i32, %c0_i32_0 : i32, i32
  }
  func.func @transform_8(%arg0: i32, %arg1: i32) -> (i32, i32) {
    %c0_i32 = arith.constant 0 : i32
    %c0_i32_0 = arith.constant 0 : i32
    %c0_i32_1 = arith.constant 0 : i32
    return %c0_i32, %c0_i32_0 : i32, i32
  }
  func.func @transform_9(%arg0: i32, %arg1: i32) -> (i32, i32) {
    %c0_i32 = arith.constant 0 : i32
    %c0_i32_0 = arith.constant 0 : i32
    %c0_i32_1 = arith.constant 0 : i32
    return %c0_i32, %c0_i32_0 : i32, i32
  }
  func.func @transform_10(%arg0: i32, %arg1: i32) -> (i32, i32) {
    %c0_i32 = arith.constant 0 : i32
    %c0_i32_0 = arith.constant 0 : i32
    %c0_i32_1 = arith.constant 0 : i32
    return %c0_i32, %c0_i32_0 : i32, i32
  }
  func.func @transform_11(%arg0: i32, %arg1: i32) -> (i32, i32) {
    %c0_i32 = arith.constant 0 : i32
    %c0_i32_0 = arith.constant 0 : i32
    %c0_i32_1 = arith.constant 0 : i32
    return %c0_i32, %c0_i32_0 : i32, i32
  }
  func.func @transform_12(%arg0: i32, %arg1: i32) -> (i32, i32, i32) {
    %c0_i32 = arith.constant 0 : i32
    %c0_i32_0 = arith.constant 0 : i32
    return %arg0, %arg1, %c0_i32 : i32, i32, i32
  }
}

module attributes {stable_mosaic.version = 11 : i64} {
  func.func @_post_attn_kernel(%arg0: i32, %arg1: i32, %arg2: memref<1x8x128xf32, #tpu.memory_space<vmem>>, %arg3: memref<1x8x128xf32, #tpu.memory_space<vmem>>, %arg4: memref<128x128xbf16, #tpu.memory_space<vmem>>, %arg5: memref<1x128xf32, #tpu.memory_space<vmem>>, %arg6: memref<1x128xf32, #tpu.memory_space<vmem>>, %arg7: memref<1x128xf32, #tpu.memory_space<vmem>>, %arg8: memref<128x256xbf16, #tpu.memory_space<vmem>>, %arg9: memref<1x256xf32, #tpu.memory_space<vmem>>, %arg10: memref<256x128xbf16, #tpu.memory_space<vmem>>, %arg11: memref<1x128xf32, #tpu.memory_space<vmem>>, %arg12: memref<1x128xf32, #tpu.memory_space<vmem>>, %arg13: memref<1x128xf32, #tpu.memory_space<vmem>>, %arg14: memref<1x8x128xf32, #tpu.memory_space<vmem>>) attributes {dimension_semantics = [#tpu.dimension_semantics<parallel>, #tpu.dimension_semantics<parallel>], iteration_bounds = array<i64: 2, 1>, scalar_prefetch = 0 : i64, scratch_operands = 0 : i64, tpu.core_type = #tpu.core_type<tc>, window_params = [{transform_indices = @transform_0, window_bounds = array<i64: 1, 8, 128>}, {transform_indices = @transform_1, window_bounds = array<i64: 1, 8, 128>}, {pipeline_mode = #tpu.pipeline_mode<synchronous>, transform_indices = @transform_2, window_bounds = array<i64: 128, 128>}, {pipeline_mode = #tpu.pipeline_mode<synchronous>, transform_indices = @transform_3, window_bounds = array<i64: 1, 128>}, {pipeline_mode = #tpu.pipeline_mode<synchronous>, transform_indices = @transform_4, window_bounds = array<i64: 1, 128>}, {pipeline_mode = #tpu.pipeline_mode<synchronous>, transform_indices = @transform_5, window_bounds = array<i64: 1, 128>}, {pipeline_mode = #tpu.pipeline_mode<synchronous>, transform_indices = @transform_6, window_bounds = array<i64: 128, 256>}, {pipeline_mode = #tpu.pipeline_mode<synchronous>, transform_indices = @transform_7, window_bounds = array<i64: 1, 256>}, {pipeline_mode = #tpu.pipeline_mode<synchronous>, transform_indices = @transform_8, window_bounds = array<i64: 256, 128>}, {pipeline_mode = #tpu.pipeline_mode<synchronous>, transform_indices = @transform_9, window_bounds = array<i64: 1, 128>}, {pipeline_mode = #tpu.pipeline_mode<synchronous>, transform_indices = @transform_10, window_bounds = array<i64: 1, 128>}, {pipeline_mode = #tpu.pipeline_mode<synchronous>, transform_indices = @transform_11, window_bounds = array<i64: 1, 128>}, {transform_indices = @transform_12, window_bounds = array<i64: 1, 8, 128>}]} {
    %c0 = arith.constant 0 : index
    %c0_0 = arith.constant 0 : index
    %c0_1 = arith.constant 0 : index
    %0 = vector.load %arg3[%c0, %c0_0, %c0_1] : memref<1x8x128xf32, #tpu.memory_space<vmem>>, vector<1x8x128xf32>
    %1 = vector.shape_cast %0 : vector<1x8x128xf32> to vector<8x128xf32>
    %c0_2 = arith.constant 0 : index
    %c0_3 = arith.constant 0 : index
    %c0_4 = arith.constant 0 : index
    %2 = vector.load %arg2[%c0_2, %c0_3, %c0_4] : memref<1x8x128xf32, #tpu.memory_space<vmem>>, vector<1x8x128xf32>
    %3 = vector.shape_cast %2 : vector<1x8x128xf32> to vector<8x128xf32>
    %4 = arith.truncf %3 : vector<8x128xf32> to vector<8x128xbf16>
    %c0_5 = arith.constant 0 : index
    %c0_6 = arith.constant 0 : index
    %5 = vector.load %arg4[%c0_5, %c0_6] : memref<128x128xbf16, #tpu.memory_space<vmem>>, vector<128x128xbf16>
    %cst = arith.constant dense<0.000000e+00> : vector<8x128xf32>
    %6 = tpu.matmul %4, %5, %cst {dimension_numbers = #tpu.dot_dimension_numbers<[1], [0], [0], [1], [0, 0, 1, 1], [], []>} : vector<8x128xbf16>, vector<128x128xbf16>, vector<8x128xf32> -> vector<8x128xf32>
    %c0_7 = arith.constant 0 : index
    %c0_8 = arith.constant 0 : index
    %7 = vector.load %arg5[%c0_7, %c0_8] : memref<1x128xf32, #tpu.memory_space<vmem>>, vector<1x128xf32>
    %8 = vector.broadcast %7 : vector<1x128xf32> to vector<8x128xf32>
    %9 = arith.addf %6, %8 : vector<8x128xf32>
    %10 = arith.addf %1, %9 : vector<8x128xf32>
    %c0_9 = arith.constant 0 : index
    %c0_10 = arith.constant 0 : index
    %11 = vector.load %arg6[%c0_9, %c0_10] : memref<1x128xf32, #tpu.memory_space<vmem>>, vector<1x128xf32>
    %c0_11 = arith.constant 0 : index
    %c0_12 = arith.constant 0 : index
    %12 = vector.load %arg7[%c0_11, %c0_12] : memref<1x128xf32, #tpu.memory_space<vmem>>, vector<1x128xf32>
    %cst_13 = arith.constant dense<0.000000e+00> : vector<8xf32>
    %13 = vector.multi_reduction <add>, %10, %cst_13 [1] : vector<8x128xf32> to vector<8xf32>
    %14 = vector.shape_cast %13 : vector<8xf32> to vector<8x1xf32>
    %cst_14 = arith.constant 1.280000e+02 : f32
    %15 = vector.broadcast %cst_14 : f32 to vector<8x1xf32>
    %16 = arith.divf %14, %15 : vector<8x1xf32>
    %17 = vector.broadcast %16 : vector<8x1xf32> to vector<8x128xf32>
    %18 = arith.subf %10, %17 : vector<8x128xf32>
    %19 = arith.mulf %18, %18 : vector<8x128xf32>
    %cst_15 = arith.constant dense<0.000000e+00> : vector<8xf32>
    %20 = vector.multi_reduction <add>, %19, %cst_15 [1] : vector<8x128xf32> to vector<8xf32>
    %21 = vector.shape_cast %20 : vector<8xf32> to vector<8x1xf32>
    %cst_16 = arith.constant 1.280000e+02 : f32
    %22 = vector.broadcast %cst_16 : f32 to vector<8x1xf32>
    %23 = arith.divf %21, %22 : vector<8x1xf32>
    %cst_17 = arith.constant 9.99999974E-6 : f32
    %24 = vector.broadcast %cst_17 : f32 to vector<8x1xf32>
    %25 = arith.addf %23, %24 : vector<8x1xf32>
    %26 = math.rsqrt %25 : vector<8x1xf32>
    %27 = vector.broadcast %26 : vector<8x1xf32> to vector<8x128xf32>
    %28 = arith.mulf %18, %27 : vector<8x128xf32>
    %29 = vector.broadcast %11 : vector<1x128xf32> to vector<8x128xf32>
    %30 = arith.mulf %28, %29 : vector<8x128xf32>
    %31 = vector.broadcast %12 : vector<1x128xf32> to vector<8x128xf32>
    %32 = arith.addf %30, %31 : vector<8x128xf32>
    %33 = arith.truncf %32 : vector<8x128xf32> to vector<8x128xbf16>
    %c0_18 = arith.constant 0 : index
    %c0_19 = arith.constant 0 : index
    %34 = vector.load %arg8[%c0_18, %c0_19] : memref<128x256xbf16, #tpu.memory_space<vmem>>, vector<128x256xbf16>
    %cst_20 = arith.constant dense<0.000000e+00> : vector<8x256xf32>
    %35 = tpu.matmul %33, %34, %cst_20 {dimension_numbers = #tpu.dot_dimension_numbers<[1], [0], [0], [1], [0, 0, 1, 1], [], []>} : vector<8x128xbf16>, vector<128x256xbf16>, vector<8x256xf32> -> vector<8x256xf32>
    %c0_21 = arith.constant 0 : index
    %c0_22 = arith.constant 0 : index
    %36 = vector.load %arg9[%c0_21, %c0_22] : memref<1x256xf32, #tpu.memory_space<vmem>>, vector<1x256xf32>
    %37 = vector.broadcast %36 : vector<1x256xf32> to vector<8x256xf32>
    %38 = arith.addf %35, %37 : vector<8x256xf32>
    %cst_23 = arith.constant 0.000000e+00 : f32
    %39 = vector.broadcast %cst_23 : f32 to vector<8x256xf32>
    %40 = arith.maximumf %38, %39 : vector<8x256xf32>
    %41 = arith.truncf %40 : vector<8x256xf32> to vector<8x256xbf16>
    %c0_24 = arith.constant 0 : index
    %c0_25 = arith.constant 0 : index
    %42 = vector.load %arg10[%c0_24, %c0_25] : memref<256x128xbf16, #tpu.memory_space<vmem>>, vector<256x128xbf16>
    %cst_26 = arith.constant dense<0.000000e+00> : vector<8x128xf32>
    %43 = tpu.matmul %41, %42, %cst_26 {dimension_numbers = #tpu.dot_dimension_numbers<[1], [0], [0], [1], [0, 0, 1, 1], [], []>} : vector<8x256xbf16>, vector<256x128xbf16>, vector<8x128xf32> -> vector<8x128xf32>
    %c0_27 = arith.constant 0 : index
    %c0_28 = arith.constant 0 : index
    %44 = vector.load %arg11[%c0_27, %c0_28] : memref<1x128xf32, #tpu.memory_space<vmem>>, vector<1x128xf32>
    %45 = vector.broadcast %44 : vector<1x128xf32> to vector<8x128xf32>
    %46 = arith.addf %43, %45 : vector<8x128xf32>
    %47 = arith.addf %32, %46 : vector<8x128xf32>
    %c0_29 = arith.constant 0 : index
    %c0_30 = arith.constant 0 : index
    %48 = vector.load %arg12[%c0_29, %c0_30] : memref<1x128xf32, #tpu.memory_space<vmem>>, vector<1x128xf32>
    %c0_31 = arith.constant 0 : index
    %c0_32 = arith.constant 0 : index
    %49 = vector.load %arg13[%c0_31, %c0_32] : memref<1x128xf32, #tpu.memory_space<vmem>>, vector<1x128xf32>
    %cst_33 = arith.constant dense<0.000000e+00> : vector<8xf32>
    %50 = vector.multi_reduction <add>, %47, %cst_33 [1] : vector<8x128xf32> to vector<8xf32>
    %51 = vector.shape_cast %50 : vector<8xf32> to vector<8x1xf32>
    %cst_34 = arith.constant 1.280000e+02 : f32
    %52 = vector.broadcast %cst_34 : f32 to vector<8x1xf32>
    %53 = arith.divf %51, %52 : vector<8x1xf32>
    %54 = vector.broadcast %53 : vector<8x1xf32> to vector<8x128xf32>
    %55 = arith.subf %47, %54 : vector<8x128xf32>
    %56 = arith.mulf %55, %55 : vector<8x128xf32>
    %cst_35 = arith.constant dense<0.000000e+00> : vector<8xf32>
    %57 = vector.multi_reduction <add>, %56, %cst_35 [1] : vector<8x128xf32> to vector<8xf32>
    %58 = vector.shape_cast %57 : vector<8xf32> to vector<8x1xf32>
    %cst_36 = arith.constant 1.280000e+02 : f32
    %59 = vector.broadcast %cst_36 : f32 to vector<8x1xf32>
    %60 = arith.divf %58, %59 : vector<8x1xf32>
    %cst_37 = arith.constant 9.99999974E-6 : f32
    %61 = vector.broadcast %cst_37 : f32 to vector<8x1xf32>
    %62 = arith.addf %60, %61 : vector<8x1xf32>
    %63 = math.rsqrt %62 : vector<8x1xf32>
    %64 = vector.broadcast %63 : vector<8x1xf32> to vector<8x128xf32>
    %65 = arith.mulf %55, %64 : vector<8x128xf32>
    %66 = vector.broadcast %48 : vector<1x128xf32> to vector<8x128xf32>
    %67 = arith.mulf %65, %66 : vector<8x128xf32>
    %68 = vector.broadcast %49 : vector<1x128xf32> to vector<8x128xf32>
    %69 = arith.addf %67, %68 : vector<8x128xf32>
    %c0_38 = arith.constant 0 : index
    %c0_39 = arith.constant 0 : index
    %c0_40 = arith.constant 0 : index
    %70 = vector.load %arg14[%c0_38, %c0_39, %c0_40] : memref<1x8x128xf32, #tpu.memory_space<vmem>>, vector<1x8x128xf32>
    %71 = vector.shape_cast %70 : vector<1x8x128xf32> to vector<8x128xf32>
    %72 = vector.shape_cast %69 : vector<8x128xf32> to vector<1x8x128xf32>
    tpu.vector_store %arg14[%c0_38, %c0_39, %c0_40], %72 {strides = array<i32>} : memref<1x8x128xf32, #tpu.memory_space<vmem>>, vector<1x8x128xf32>,
    return
  }
  func.func @transform_0(%arg0: i32, %arg1: i32) -> (i32, i32, i32) {
    %c0_i32 = arith.constant 0 : i32
    %c0_i32_0 = arith.constant 0 : i32
    return %arg0, %arg1, %c0_i32 : i32, i32, i32
  }
  func.func @transform_1(%arg0: i32, %arg1: i32) -> (i32, i32, i32) {
    %c0_i32 = arith.constant 0 : i32
    %c0_i32_0 = arith.constant 0 : i32
    return %arg0, %arg1, %c0_i32 : i32, i32, i32
  }
  func.func @transform_2(%arg0: i32, %arg1: i32) -> (i32, i32) {
    %c0_i32 = arith.constant 0 : i32
    %c0_i32_0 = arith.constant 0 : i32
    %c0_i32_1 = arith.constant 0 : i32
    return %c0_i32, %c0_i32_0 : i32, i32
  }
  func.func @transform_3(%arg0: i32, %arg1: i32) -> (i32, i32) {
    %c0_i32 = arith.constant 0 : i32
    %c0_i32_0 = arith.constant 0 : i32
    %c0_i32_1 = arith.constant 0 : i32
    return %c0_i32, %c0_i32_0 : i32, i32
  }
  func.func @transform_4(%arg0: i32, %arg1: i32) -> (i32, i32) {
    %c0_i32 = arith.constant 0 : i32
    %c0_i32_0 = arith.constant 0 : i32
    %c0_i32_1 = arith.constant 0 : i32
    return %c0_i32, %c0_i32_0 : i32, i32
  }
  func.func @transform_5(%arg0: i32, %arg1: i32) -> (i32, i32) {
    %c0_i32 = arith.constant 0 : i32
    %c0_i32_0 = arith.constant 0 : i32
    %c0_i32_1 = arith.constant 0 : i32
    return %c0_i32, %c0_i32_0 : i32, i32
  }
  func.func @transform_6(%arg0: i32, %arg1: i32) -> (i32, i32) {
    %c0_i32 = arith.constant 0 : i32
    %c0_i32_0 = arith.constant 0 : i32
    %c0_i32_1 = arith.constant 0 : i32
    return %c0_i32, %c0_i32_0 : i32, i32
  }
  func.func @transform_7(%arg0: i32, %arg1: i32) -> (i32, i32) {
    %c0_i32 = arith.constant 0 : i32
    %c0_i32_0 = arith.constant 0 : i32
    %c0_i32_1 = arith.constant 0 : i32
    return %c0_i32, %c0_i32_0 : i32, i32
  }
  func.func @transform_8(%arg0: i32, %arg1: i32) -> (i32, i32) {
    %c0_i32 = arith.constant 0 : i32
    %c0_i32_0 = arith.constant 0 : i32
    %c0_i32_1 = arith.constant 0 : i32
    return %c0_i32, %c0_i32_0 : i32, i32
  }
  func.func @transform_9(%arg0: i32, %arg1: i32) -> (i32, i32) {
    %c0_i32 = arith.constant 0 : i32
    %c0_i32_0 = arith.constant 0 : i32
    %c0_i32_1 = arith.constant 0 : i32
    return %c0_i32, %c0_i32_0 : i32, i32
  }
  func.func @transform_10(%arg0: i32, %arg1: i32) -> (i32, i32) {
    %c0_i32 = arith.constant 0 : i32
    %c0_i32_0 = arith.constant 0 : i32
    %c0_i32_1 = arith.constant 0 : i32
    return %c0_i32, %c0_i32_0 : i32, i32
  }
  func.func @transform_11(%arg0: i32, %arg1: i32) -> (i32, i32) {
    %c0_i32 = arith.constant 0 : i32
    %c0_i32_0 = arith.constant 0 : i32
    %c0_i32_1 = arith.constant 0 : i32
    return %c0_i32, %c0_i32_0 : i32, i32
  }
  func.func @transform_12(%arg0: i32, %arg1: i32) -> (i32, i32, i32) {
    %c0_i32 = arith.constant 0 : i32
    %c0_i32_0 = arith.constant 0 : i32
    return %arg0, %arg1, %c0_i32 : i32, i32, i32
  }
}

</mosaic_0001>

<bundles_post_ra>
// kernel: _lambda_.6
= control target key start
LH: loop header
LB: loop body
LE: loop exit
PB: predicated region body
PF: predicated region fallthrough
CT: control target
= control target key end

     0   :  { %s697_s12 = smov 0   ;;  %s699_s13 = smov 0   ;;  %s885_s0 = inlined_call_operand.vmem [shape: f32[2,8,128], index: 0, kind: input, shape index: {}]   ;;  %s886_s1 = inlined_call_operand.vmem [shape: bf16[128,384], index: 1, kind: input, shape index: {}]   ;;  %s887_s2 = inlined_call_operand.vmem [shape: f32[1,384], index: 2, kind: input, shape index: {}]   ;;  %s888_s3 = inlined_call_operand.vmem [shape: f32[2,8,384], index: 3, kind: output, shape index: {}]  }
   0x1   :  { %s701_s14 = smov 0  }
   0x2 LB: > { %s25_s15 = sadd.s32 1, %s671_s13  ;;  %p503_p0 = scmp.ge.s32.totalorder %s675_s14, 1  ;;  %s675_s14 = sphi %s701_s14, %s13_s14   ;;  %s671_s13 = sphi %s699_s13, %s890_s13   ;;  %s667_s12 = sphi %s697_s12, %s889_s12  }
   0x3   : > { %p27_p1 = scmp.ge.s32.totalorder %s25_s15, 2  ;;  %p155_p2 = scmp.lt.s32.totalorder %s675_s14, 3 }
   0x5   : > { %s892_s15 = smov (%p27_p1, %s25_s15), 0  ;;  %p156_p3 = pnand %p503_p0, %p155_p2 }
   0x6   : > { %p185_p4 = scmp.lt.s32.totalorder (!%p156_p3), %s667_s12, 1 }
   0x7   : > { %159 = sbr.rel (%p156_p3) target bundleno = 187 (0xbb), region = 32 }
   0xc   : > { %v592_v0 = vld [vmem:[%s886_s1 + $0xa8] sm:$0xf]  ;;  %v626_v1 = vld [vmem:[%s886_s1 + $0xb0] sm:$0xf0]  ;;  %v625_v2 = vld [vmem:[%s886_s1 + $0xac] sm:$0xf] }
   0xd   : > { %v593_v3 = vor.u32 %v626_v1, %v592_v0  ;;  %v594_v4 = vld [vmem:[%s886_s1 + $0xb4] sm:$0xf0]  ;;  %v600_v5 = vld [vmem:[%s886_s1 + $0xb0] sm:$0xf]  ;;  %v627_v6 = vld [vmem:[%s886_s1 + $0xb8] sm:$0xf0] }
   0xe   : > { %v597_v7 = vor.u32 %v625_v2, %v594_v4  ;;  %v601_v8 = vor.u32 %v627_v6, %v600_v5  ;;  %v580_v9 = vld [vmem:[%s886_s1 + $0x90] sm:$0xf]  ;;  %v623_v10 = vld [vmem:[%s886_s1 + $0x98] sm:$0xf0]  ;;  %v622_v11 = vld [vmem:[%s886_s1 + $0x94] sm:$0xf] }
   0xf   : > { %371 = vmatpush.bf16.msra.mxu0 %v593_v3  ;;  %v581_v12 = vor.u32 %v623_v10, %v580_v9  ;;  %v582_v13 = vld [vmem:[%s886_s1 + $0x9c] sm:$0xf0]  ;;  %v588_v14 = vld [vmem:[%s886_s1 + $0x98] sm:$0xf]  ;;  %v624_v15 = vld [vmem:[%s886_s1 + $0xa0] sm:$0xf0] }
  0x10   : > { %384 = vmatpush.bf16.msra.mxu1 %v597_v7  ;;  %397 = vmatpush.bf16.msra.mxu2 %v601_v8  ;;  %v585_v16 = vor.u32 %v622_v11, %v582_v13  ;;  %v589_v17 = vor.u32 %v624_v15, %v588_v14  ;;  %v568_v18 = vld [vmem:[%s886_s1 + $0x78] sm:$0xf]  ;;  %v620_v19 = vld [vmem:[%s886_s1 + $0x80] sm:$0xf0]  ;;  %v619_v20 = vld [vmem:[%s886_s1 + $0x7c] sm:$0xf] }
  0x11   : > { %v570_v21 = vld [vmem:[%s886_s1 + $0x84] sm:$0xf0]  ;;  %v576_v22 = vld [vmem:[%s886_s1 + $0x80] sm:$0xf]  ;;  %v621_v23 = vld [vmem:[%s886_s1 + $0x88] sm:$0xf0]  ;;  %v569_v24 = vor.u32 %v620_v19, %v568_v18 }
  0x12   : > { %v573_v25 = vor.u32 %v619_v20, %v570_v21  ;;  %v577_v26 = vor.u32 %v621_v23, %v576_v22  ;;  %v556_v27 = vld [vmem:[%s886_s1 + $0x60] sm:$0xf]  ;;  %v617_v28 = vld [vmem:[%s886_s1 + $0x68] sm:$0xf0]  ;;  %v616_v29 = vld [vmem:[%s886_s1 + $0x64] sm:$0xf] }
  0x13   : > { %372 = vmatpush.bf16.msra.mxu0 %v581_v12  ;;  %v558_v30 = vld [vmem:[%s886_s1 + $0x6c] sm:$0xf0]  ;;  %v564_v31 = vld [vmem:[%s886_s1 + $0x68] sm:$0xf]  ;;  %v618_v32 = vld [vmem:[%s886_s1 + $0x70] sm:$0xf0]  ;;  %v557_v33 = vor.u32 %v617_v28, %v556_v27 }
  0x14   : > { %385 = vmatpush.bf16.msra.mxu1 %v585_v16  ;;  %398 = vmatpush.bf16.msra.mxu2 %v589_v17  ;;  %v561_v34 = vor.u32 %v616_v29, %v558_v30  ;;  %v565_v35 = vor.u32 %v618_v32, %v564_v31  ;;  %v544_v36 = vld [vmem:[%s886_s1 + $0x48] sm:$0xf]  ;;  %v614_v37 = vld [vmem:[%s886_s1 + $0x50] sm:$0xf0]  ;;  %v613_v38 = vld [vmem:[%s886_s1 + $0x4c] sm:$0xf] }
  0x15   : > { %v546_v39 = vld [vmem:[%s886_s1 + $0x54] sm:$0xf0]  ;;  %v552_v40 = vld [vmem:[%s886_s1 + $0x50] sm:$0xf]  ;;  %v615_v41 = vld [vmem:[%s886_s1 + $0x58] sm:$0xf0]  ;;  %v545_v42 = vor.u32 %v614_v37, %v544_v36 }
  0x16   : > { %v532_v43 = vld [vmem:[%s886_s1 + $0x30] sm:$0xf]  ;;  %v549_v44 = vor.u32 %v613_v38, %v546_v39  ;;  %v553_v45 = vor.u32 %v615_v41, %v552_v40  ;;  %v611_v46 = vld [vmem:[%s886_s1 + $0x38] sm:$0xf0]  ;;  %v610_v47 = vld [vmem:[%s886_s1 + $0x34] sm:$0xf] }
  0x17   : > { %373 = vmatpush.bf16.msra.mxu0 %v569_v24  ;;  %v534_v48 = vld [vmem:[%s886_s1 + $0x3c] sm:$0xf0]  ;;  %v540_v49 = vld [vmem:[%s886_s1 + $0x38] sm:$0xf]  ;;  %v612_v50 = vld [vmem:[%s886_s1 + $0x40] sm:$0xf0]  ;;  %v533_v51 = vor.u32 %v611_v46, %v532_v43 }
  0x18   : > { %386 = vmatpush.bf16.msra.mxu1 %v573_v25  ;;  %399 = vmatpush.bf16.msra.mxu2 %v577_v26  ;;  %s894_s12 = smov (!%p185_p4, %s667_s12), 1  ;;  %v520_v52 = vld [vmem:[%s886_s1 + $0x18] sm:$0xf]  ;;  %v537_v53 = vor.u32 %v610_v47, %v534_v48  ;;  %v541_v54 = vor.u32 %v612_v50, %v540_v49  ;;  %v608_v55 = vld [vmem:[%s886_s1 + $0x20] sm:$0xf0] }
  0x19   : > { %v607_v56 = vld [vmem:[%s886_s1 + $0x1c] sm:$0xf]  ;;  %v522_v57 = vld [vmem:[%s886_s1 + $0x24] sm:$0xf0]  ;;  %v528_v58 = vld [vmem:[%s886_s1 + $0x20] sm:$0xf]  ;;  %v521_v60 = vor.u32 %v608_v55, %v520_v52 }
  0x1a   : > { %v609_v59 = vld [vmem:[%s886_s1 + $0x28] sm:$0xf0]  ;;  %s504_s4 = sshll.u32 %s894_s12, 3  ;;  %v525_v61 = vor.u32 %v607_v56, %v522_v57  ;;  %v508_v63 = vld [vmem:[%s886_s1] sm:$0xf]  ;;  %s628_s26 = smul.u32 24, %s894_s12 }
  0x1b   : > { %374 = vmatpush.bf16.msra.mxu0 %v557_v33  ;;  %v529_v62 = vor.u32 %v609_v59, %v528_v58  ;;  %v605_v0 = vld [vmem:[%s886_s1 + $0x8] sm:$0xf0]  ;;  %v604_v1 = vld [vmem:[%s886_s1 + $0x4] sm:$0xf]  ;;  %s191_s17 = scalar_lea.vmem %s885_s0, %s504_s4  ;;  %v510_v2 = vld [vmem:[%s886_s1 + $0xc] sm:$0xf0] }
  0x1c   : > { %387 = vmatpush.bf16.msra.mxu1 %v561_v34  ;;  %400 = vmatpush.bf16.msra.mxu2 %v565_v35  ;;  %v516_v3 = vld [vmem:[%s886_s1 + $0x8] sm:$0xf]  ;;  %v606_v4 = vld [vmem:[%s886_s1 + $0x10] sm:$0xf0]  ;;  %v509_v5 = vor.u32 %v605_v0, %v508_v63  ;;  %v201_v6 = vld [vmem:[%s191_s17] sm:$0xff]  ;;  %v513_v7 = vor.u32 %v604_v1, %v510_v2  ;;  %s200_s29 = scalar_lea.vmem %s888_s3, %s628_s26 }
  0x1d   : > { %v517_v8 = vor.u32 %v606_v4, %v516_v3  ;;  %v202_v9 = vpack.c.bf16 %v201_v6, %v201_v6  ;;  %v235_v10 = vld [vmem:[%s887_s2] sm:$0x7] }
  0x1e   : > { %v237_v11 = vperm.slane %v235_v10, 0  ;;  %v238_v12 = vperm.slane %v235_v10, 1  ;;  %v239_v17 = vperm.slane %v235_v10, 2 }
  0x1f   : > { %375 = vmatpush.bf16.msra.mxu0 %v545_v42 }
  0x20   : > { %388 = vmatpush.bf16.msra.mxu1 %v549_v44  ;;  %401 = vmatpush.bf16.msra.mxu2 %v553_v45 }
  0x23   : > { %376 = vmatpush.bf16.msra.mxu0 %v533_v51 }
  0x24   : > { %389 = vmatpush.bf16.msra.mxu1 %v537_v53  ;;  %402 = vmatpush.bf16.msra.mxu2 %v541_v54 }
  0x27   : > { %377 = vmatpush.bf16.msra.mxu0 %v521_v60 }
  0x28   : > { %390 = vmatpush.bf16.msra.mxu1 %v525_v61  ;;  %403 = vmatpush.bf16.msra.mxu2 %v529_v62 }
  0x2b   : > { %378 = vmatpush.bf16.msra.mxu0 %v509_v5 }
  0x2c   : > { %391 = vmatpush.bf16.msra.mxu1 %v513_v7  ;;  %404 = vmatpush.bf16.msra.mxu2 %v517_v8 }
  0x2e   : > { %379 = vmatmul.bf16.vlgmr.msra.gmra.mxu0 %v202_v9 }
  0x2f   : > { %392 = vmatmul.bf16.vlgmr.msra.gmra.mxu1 %v202_v9  ;;  %405 = vmatmul.bf16.vlgmr.msra.gmra.mxu2 %v202_v9 }
  0xab   : > { %v380_v13 = vpop.f32.mrf.mxu0 }
  0xac   : > { %v381_v14 = vadd.f32 %v380_v13, %v237_v11  ;;  %v393_v15 = vpop.f32.mrf.mxu1 }
  0xad   : > { %v394_v16 = vadd.f32 %v393_v15, %v238_v12 }
  0xae   : > { %410 = vst [vmem:[%s200_s29] sm:$0xff] %v381_v14 }
  0xaf   : > { %411 = vst [vmem:[%s200_s29 + $0x8] sm:$0xff] %v394_v16 }
  0xb2   : > { %v406_v18 = vpop.f32.mrf.mxu2 }
  0xb3   : > { %v407_v19 = vadd.f32 %v406_v18, %v239_v17  ;;  %v382_v20 = vpop.f32.mrf.mxu0 }
  0xb4   : > { %v395_v21 = vpop.f32.mrf.mxu1 }
  0xb5   : > { %412 = vst [vmem:[%s200_s29 + $0x10] sm:$0xff] %v407_v19 }
  0xba   : > { %v408_v22 = vpop.f32.mrf.mxu2 }
  0xbb PF: > { %s13_s14 = sadd.s32 1, %s675_s14   ;;  %s889_s12 = smov %s671_s13 }
  0xbc   : > { %p10_p5 = scmp.ge.s32.totalorder %s13_s14, 4   ;;  %s890_s13 = smov %s892_s15 }
  0xbe   :  { %12 = sbr.rel (!%p10_p5) target bundleno = 2 (0x2), region = 62 }

// kernel: _lambda_.7
= control target key start
LH: loop header
LB: loop body
LE: loop exit
PB: predicated region body
PF: predicated region fallthrough
CT: control target
= control target key end

     0   :  { %s493_s6 = smov 0   ;;  %s563_s0 = inlined_call_operand.vmem [shape: f32[2,8,384], index: 0, kind: input, shape index: {}]   ;;  %s564_s1 = inlined_call_operand.vmem [shape: f32[2,8,128], index: 1, kind: output, shape index: {}]  }
   0x1 LB: > { %s427_s7 = sadd.s32 4294967295, %s478_s6   ;;  %p431_p0 = scmp.ge.s32.totalorder %s478_s6, 1  ;;  %s478_s6 = sphi %s493_s6, %s11_s6  }
   0x2   : > { %p87_p1 = scmp.lt.s32.totalorder %s478_s6, 3 }
   0x4   : > { %p88_p2 = pnand %p431_p0, %p87_p1 }
   0x5   : > { %p106_p3 = scmp.lt.s32.totalorder (!%p88_p2), %s427_s7, 1  ;;  %s480_s12 = smov (!%p88_p2), 64  }
   0x6   : > { %91 = sbr.rel (%p88_p2) target bundleno = 1080 (0x438), region = 24  ;;  %s481_s13 = smov (!%p88_p2), 32  }
   0x7   : > { %s482_s14 = smov (!%p88_p2), 96  }
   0xb   : > { %s566_s7 = smov (!%p106_p3, %s427_s7), 1  ;;  %vm128_vm0 = vcmask 261120   ;;  %v120_v6 = vlaneseq  ;;  %vm149_vm2 = vcmask 64512   ;;  %vm165_vm3 = vcmask 1043456  }
   0xc   : > { %s444_s8 = smul.u32 24, %s566_s7  ;;  %s433_s15 = sshll.u32 %s566_s7, 3  ;;  %vm369_vm4 = vcmask 523264   ;;  %vm371_vm5 = vcmask 785408  }
   0xd   : > { %v121_v7 = vshrl.u32 %v120_v6, 7  ;;  %v123_v8 = vand.u32 127, %v120_v6  ;;  %s114_s18 = scalar_lea.vmem %s564_s1, %s433_s15 }
   0xe   : > { %s507_s11 = scalar_lea.vmem %s563_s0, %s444_s8 }
   0xf   : > { %v117_v0 = vld [vmem:[%s507_s11 + $0x8] sm:$0xff]  ;;  %v116_v1 = vld [vmem:[%s507_s11] sm:$0xff]  ;;  %vm124_vm1 = vcmp.le.s32.totalorder %v123_v8, %v121_v7  ;;  %v118_v23 = vld [vmem:[%s507_s11 + $0x10] sm:$0xff] }
  0x10   : > { %v126_v2 = vpack.c.bf16 %v117_v0, %v117_v0  ;;  %v119_v4 = vmul.f32 0.17677669, %v116_v1  ;;  %v127_v24 = vpack.c.bf16 %v118_v23, %v118_v23 }
  0x12   : > { %v133_v3 = vsel %vm128_vm0, %v126_v2, 0  ;;  %v125_v5 = vpack.c.bf16 %v119_v4, %v119_v4  ;;  %244 = vrot.lane.b32.xlu2 %v126_v2, %s480_s12  ;;  %v167_v25 = vsel %vm165_vm3, %v127_v24, 0 }
  0x13   : > { %142 = vmatpush.bf16.xpose.msra.mxu0 %v133_v3  ;;  %176 = vmatpush.bf16.msra.mxu1 %v167_v25 }
  0x1a   : > { %434 = vmatmul.msk.bf16.vlgmr.msra.gmra.mxu0 %vm128_vm0, %v125_v5  ;;  %301 = vrot.lane.b32.xlu2 %v126_v2, %s481_s13 }
  0x22   : > { %242 = vrot.lane.b32.xlu2 %v125_v5, %s480_s12 }
  0x2a   : > { %299 = vrot.lane.b32.xlu2 %v125_v5, %s481_s13 }
  0x6c   : > { %v245_v13 = vpop.permute.xlu2 %244 }
  0x6d   : > { %v250_v26 = vsel %vm128_vm0, %v245_v13, 0 }
  0x6e   : > { %259 = vmatpush.bf16.xpose.msrb.mxu1 %v250_v26 }
  0x74   : > { %v302_v14 = vpop.permute.xlu2 %301 }
  0x75   : > { %v307_v19 = vsel %vm128_vm0, %v302_v14, 0 }
  0x76   : > { %316 = vmatpush.bf16.xpose.msrb.mxu0 %v307_v19 }
  0x7c   : > { %v243_v18 = vpop.permute.xlu2 %242 }
  0x84   : > { %v300_v22 = vpop.permute.xlu2 %299 }
  0x85   : > { %440 = vmatmul.msk.bf16.vlgmr.msrb.gmra.mxu0 %vm128_vm0, %v300_v22 }
  0x97   : > { %v144_v9 = vpop.f32.mrf.mxu0 }
  0x98   : > { %v148_v10 = vsel %vm124_vm1, %v144_v9, -inf }
  0x99   : > { %v150_v11 = vsel %vm149_vm2, %v148_v10, -inf }
  0x9a   : > { %151 = vmax.xlane.f32.xlu0 %v150_v11 }
  0x9f   : > { %v146_v12 = vpop.f32.mrf.mxu0 }
  0xae   : > { %186 = vrot.lane.b32.xlu0 %v126_v2, %s482_s14 }
 0x102   : > { %v318_v33 = vpop.f32.mrf.mxu0 }
 0x103   : > { %v322_v34 = vsel %vm124_vm1, %v318_v33, -inf }
 0x104   : > { %v323_v35 = vsel %vm149_vm2, %v322_v34, -inf }
 0x10a   : > { %v320_v36 = vpop.f32.mrf.mxu0 }
 0x10d   : > { %v152_v15 = vpop.xlane.xlu0 %151 }
 0x10e   : > { %v153_v16 = vsub.f32 %v148_v10, %v152_v15 }
 0x110   : > { %v154_v17 = vmul.f32 1.442695, %v153_v16 }
 0x112   : > { %456 = vpow2.f32 %v154_v17 }
 0x118   : > { %v457_v20 = vpop.eup %456 }
 0x119   : > { %v156_v21 = vsel %vm149_vm2, %v457_v20, 0.0 }
 0x11a   : > { %157 = vadd.xlane.f32.xlu1 %v156_v21 }
 0x120   : > { %v187_v27 = vpop.permute.xlu0 %186 }
 0x121   : > { %v192_v28 = vsel %vm128_vm0, %v187_v27, 0 }
 0x122   : > { %201 = vmatpush.bf16.xpose.msra.mxu2 %v192_v28 }
 0x133   : > { %183 = vrot.lane.b32.xlu1 %v125_v5, %s482_s14 }
 0x15d   : > { %324 = vmax.xlane.f32.xlu1 %v323_v35 }
 0x18d   : > { %v158_v29 = vpop.xlane.xlu1 %157 }
 0x18e   : > { %458 = vrcp.f32 %v158_v29 }
 0x194   : > { %v459_v30 = vpop.eup %458 }
 0x195   : > { %v160_v31 = vmul.f32 %v459_v30, %v457_v20 }
 0x197   : > { %v161_v32 = vpack.c.bf16 %v160_v31, %v160_v31 }
 0x199   : > { %435 = vmatmul.msk.bf16.vlgmr.msra.gmra.mxu1 %vm149_vm2, %v161_v32 }
 0x1a5   : > { %v184_v37 = vpop.permute.xlu1 %183 }
 0x1a6   : > { %436 = vmatmul.msk.bf16.vlgmr.msra.gmra.mxu2 %vm128_vm0, %v184_v37 }
 0x1a9   : > { %438 = vmatmul.msk.bf16.vlgmr.msrb.gmra.mxu1 %vm128_vm0, %v243_v18 }
 0x1d0   : > { %v325_v50 = vpop.xlane.xlu1 %324 }
 0x1d1   : > { %v326_v54 = vsub.f32 %v322_v34, %v325_v50 }
 0x1d3   : > { %v327_v56 = vmul.f32 1.442695, %v326_v54 }
 0x216   : > { %v533_v38 = vpop.f32.mrf.mxu1 }
 0x21e   : > { %v180_v39 = vpop.f32.mrf.mxu1 }
 0x226   : > { %v261_v40 = vpop.f32.mrf.mxu1 }
 0x227   : > { %v265_v41 = vsel %vm124_vm1, %v261_v40, -inf }
 0x228   : > { %v266_v42 = vsel %vm149_vm2, %v265_v41, -inf }
 0x229   : > { %267 = vmax.xlane.f32.xlu2 %v266_v42  ;;  %v203_v43 = vpop.f32.mrf.mxu2 }
 0x22a   : > { %v207_v44 = vsel %vm124_vm1, %v203_v43, -inf }
 0x22b   : > { %v208_v45 = vsel %vm149_vm2, %v207_v44, -inf }
 0x22c   : > { %209 = vmax.xlane.f32.xlu0 %v208_v45 }
 0x22e   : > { %v263_v46 = vpop.f32.mrf.mxu1 }
 0x231   : > { %v205_v47 = vpop.f32.mrf.mxu2 }
 0x241   : > { %221 = vrot.lane.b32.xlu2 %v127_v24, %s482_s14 }
 0x29c   : > { %v268_v48 = vpop.xlane.xlu2 %267 }
 0x29d   : > { %v269_v49 = vsub.f32 %v265_v41, %v268_v48 }
 0x29f   : > { %v270_v51 = vmul.f32 1.442695, %v269_v49  ;;  %v210_v52 = vpop.xlane.xlu0 %209 }
 0x2a0   : > { %v211_v53 = vsub.f32 %v207_v44, %v210_v52 }
 0x2a1   : > { %460 = vpow2.f32 %v270_v51 }
 0x2a2   : > { %v212_v55 = vmul.f32 1.442695, %v211_v53 }
 0x2a4   : > { %462 = vpow2.f32 %v212_v55  ;;  %v222_v63 = vpop.permute.xlu2 %221 }
 0x2a5   : > { %464 = vpow2.f32 %v327_v56  ;;  %v227_v0 = vsel %vm165_vm3, %v222_v63, 0 }
 0x2a6   : > { %236 = vmatpush.bf16.msra.mxu3 %v227_v0 }
 0x2a7   : > { %v461_v57 = vpop.eup %460 }
 0x2a8   : > { %v272_v58 = vsel %vm149_vm2, %v461_v57, 0.0 }
 0x2a9   : > { %273 = vadd.xlane.f32.xlu1 %v272_v58 }
 0x2aa   : > { %v463_v59 = vpop.eup %462 }
 0x2ab   : > { %v214_v60 = vsel %vm149_vm2, %v463_v59, 0.0  ;;  %v465_v61 = vpop.eup %464 }
 0x2ac   : > { %215 = vadd.xlane.f32.xlu0 %v214_v60  ;;  %v329_v62 = vsel %vm149_vm2, %v465_v61, 0.0 }
 0x2b4   : > { %330 = vadd.xlane.f32.xlu0 %v329_v62 }
 0x2c2   : > { %278 = vrot.lane.b32.xlu1 %v127_v24, %s480_s12 }
 0x2c8   : > { %335 = vrot.lane.b32.xlu0 %v127_v24, %s481_s13 }
 0x31c   : > { %v274_v4 = vpop.xlane.xlu1 %273 }
 0x31f   : > { %v216_v1 = vpop.xlane.xlu0 %215 }
 0x320   : > { %466 = vrcp.f32 %v216_v1 }
 0x321   : > { %468 = vrcp.f32 %v274_v4 }
 0x326   : > { %v467_v2 = vpop.eup %466 }
 0x327   : > { %v218_v3 = vmul.f32 %v467_v2, %v463_v59  ;;  %v331_v6 = vpop.xlane.xlu0 %330  ;;  %v469_v7 = vpop.eup %468 }
 0x328   : > { %470 = vrcp.f32 %v331_v6  ;;  %v276_v9 = vmul.f32 %v469_v7, %v461_v57 }
 0x329   : > { %v219_v5 = vpack.c.bf16 %v218_v3, %v218_v3 }
 0x32a   : > { %v277_v13 = vpack.c.bf16 %v276_v9, %v276_v9 }
 0x32b   : > { %437 = vmatmul.msk.bf16.vlgmr.msra.gmra.mxu3 %vm149_vm2, %v219_v5 }
 0x32e   : > { %v471_v11 = vpop.eup %470 }
 0x32f   : > { %v333_v12 = vmul.f32 %v471_v11, %v465_v61 }
 0x331   : > { %v334_v16 = vpack.c.bf16 %v333_v12, %v333_v12 }
 0x334   : > { %v279_v8 = vpop.permute.xlu1 %278 }
 0x335   : > { %v284_v10 = vsel %vm165_vm3, %v279_v8, 0 }
 0x336   : > { %293 = vmatpush.bf16.msrb.mxu3 %v284_v10 }
 0x33a   : > { %v336_v14 = vpop.permute.xlu0 %335 }
 0x33b   : > { %439 = vmatmul.msk.bf16.vlgmr.msrb.gmra.mxu3 %vm149_vm2, %v277_v13  ;;  %v341_v15 = vsel %vm165_vm3, %v336_v14, 0 }
 0x33c   : > { %350 = vmatpush.bf16.msrb.mxu2 %v341_v15 }
 0x33f   : > { %441 = vmatmul.msk.bf16.vlgmr.msrb.gmra.mxu2 %vm149_vm2, %v334_v16 }
 0x3ae   : > { %v238_v17 = vpop.f32.mrf.mxu3 }
 0x3af   : > { %357 = vrot.lane.b32.xlu2 %v238_v17, %s481_s13 }
 0x3b6   : > { %v240_v18 = vpop.f32.mrf.mxu3 }
 0x3be   : > { %v295_v19 = vpop.f32.mrf.mxu3 }
 0x3bf   : > { %361 = vrot.lane.b32.xlu2 %v295_v19, %s480_s12 }
 0x3c2   : > { %v352_v20 = vpop.f32.mrf.mxu2 }
 0x3c3   : > { %365 = vrot.lane.b32.xlu0 %v352_v20, %s482_s14 }
 0x3c6   : > { %v297_v21 = vpop.f32.mrf.mxu3 }
 0x3ca   : > { %v354_v22 = vpop.f32.mrf.mxu2 }
 0x409   : > { %v358_v23 = vpop.permute.xlu2 %357 }
 0x40a   : > { %v368_v25 = vsel %vm128_vm0, %v533_v38, %v358_v23 }
 0x419   : > { %v362_v24 = vpop.permute.xlu2 %361 }
 0x41a   : > { %v370_v26 = vsel %vm369_vm4, %v368_v25, %v362_v24 }
 0x435   : > { %v366_v27 = vpop.permute.xlu0 %365 }
 0x436   : > { %v372_v28 = vsel %vm371_vm5, %v370_v26, %v366_v27 }
 0x437   : > { %373 = vst [vmem:[%s114_s18] sm:$0xff] %v372_v28 }
 0x438 PF: > { %s11_s6 = sadd.s32 1, %s478_s6  }
 0x439   : > { %p8_p4 = scmp.ge.s32.totalorder %s11_s6, 4  }
 0x43b   :  { %10 = sbr.rel (!%p8_p4) target bundleno = 1 (0x1), region = 54 }

// kernel: _lambda_.8
= control target key start
LH: loop header
LB: loop body
LE: loop exit
PB: predicated region body
PF: predicated region fallthrough
CT: control target
= control target key end

     0   :  { %s1339_s21 = smov 0   ;;  %s1341_s22 = smov 0   ;;  %s1580_s0 = inlined_call_operand.vmem [shape: f32[2,8,128], index: 0, kind: input, shape index: {}]   ;;  %s1581_s1 = inlined_call_operand.vmem [shape: f32[2,8,128], index: 1, kind: input, shape index: {}]   ;;  %s1582_s2 = inlined_call_operand.vmem [shape: bf16[128,128], index: 2, kind: input, shape index: {}]   ;;  %s1583_s3 = inlined_call_operand.vmem [shape: f32[1,128], index: 3, kind: input, shape index: {}]   ;;  %s1584_s4 = inlined_call_operand.vmem [shape: f32[1,128], index: 4, kind: input, shape index: {}]   ;;  %s1585_s5 = inlined_call_operand.vmem [shape: f32[1,128], index: 5, kind: input, shape index: {}]   ;;  %s1586_s6 = inlined_call_operand.vmem [shape: bf16[128,256], index: 6, kind: input, shape index: {}]   ;;  %s1587_s7 = inlined_call_operand.vmem [shape: f32[1,256], index: 7, kind: input, shape index: {}]   ;;  %s1588_s8 = inlined_call_operand.vmem [shape: bf16[256,128], index: 8, kind: input, shape index: {}]   ;;  %s1589_s9 = inlined_call_operand.vmem [shape: f32[1,128], index: 9, kind: input, shape index: {}]   ;;  %s1590_s10 = inlined_call_operand.vmem [shape: f32[1,128], index: 10, kind: input, shape index: {}]   ;;  %s1591_s11 = inlined_call_operand.vmem [shape: f32[1,128], index: 11, kind: input, shape index: {}]   ;;  %s1592_s12 = inlined_call_operand.vmem [shape: f32[2,8,128], index: 12, kind: output, shape index: {}]  }
   0x1   :  { %s1343_s23 = smov 0  }
   0x2 LB: > { %s34_s24 = sadd.s32 1, %s1267_s22  ;;  %p1006_p0 = scmp.ge.s32.totalorder %s1271_s23, 1  ;;  %s1271_s23 = sphi %s1343_s23, %s22_s23   ;;  %s1267_s22 = sphi %s1341_s22, %s1594_s22   ;;  %s1263_s21 = sphi %s1339_s21, %s1593_s21  }
   0x3   : > { %p36_p1 = scmp.ge.s32.totalorder %s34_s24, 2  ;;  %p394_p2 = scmp.lt.s32.totalorder %s1271_s23, 3 }
   0x5   : > { %s1596_s24 = smov (%p36_p1, %s34_s24), 0  ;;  %p395_p3 = pnand %p1006_p0, %p394_p2 }
   0x6   : > { %p447_p4 = scmp.lt.s32.totalorder (!%p395_p3), %s1263_s21, 1 }
   0x7   : > { %398 = sbr.rel (%p395_p3) target bundleno = 979 (0x3d3), region = 68 }
   0xc   : > { %v1179_v0 = vld [vmem:[%s1582_s2 + $0x38] sm:$0xff]  ;;  %v1178_v1 = vld [vmem:[%s1582_s2 + $0x30] sm:$0xff]  ;;  %v1177_v2 = vld [vmem:[%s1582_s2 + $0x28] sm:$0xff]  ;;  %s1598_s21 = smov (!%p447_p4, %s1263_s21), 1  ;;  %v1273_v16 = vmov 128.0  }
   0xd   : > { %539 = vmatpush.bf16.msra.mxu0 %v1179_v0  ;;  %v1176_v3 = vld [vmem:[%s1582_s2 + $0x20] sm:$0xff]  ;;  %v1175_v4 = vld [vmem:[%s1582_s2 + $0x18] sm:$0xff]  ;;  %v1174_v5 = vld [vmem:[%s1582_s2 + $0x10] sm:$0xff]  ;;  %s1375_s19 = sshll.u32 %s1598_s21, 3  ;;  %1243 = vrcp.f32 %v1273_v16 }
   0xe   : > { %v1173_v6 = vld [vmem:[%s1582_s2 + $0x8] sm:$0xff]  ;;  %s453_s28 = scalar_lea.vmem %s1580_s0, %s1375_s19  ;;  %v1172_v7 = vld [vmem:[%s1582_s2] sm:$0xff]  ;;  %s460_s16 = scalar_lea.vmem %s1581_s1, %s1375_s19  ;;  %v1100_v17 = vld [vmem:[%s1586_s6 + $0x70] sm:$0xf] }
   0xf   : > { %v469_v8 = vld [vmem:[%s453_s28] sm:$0xff]  ;;  %v1195_v18 = vld [vmem:[%s1586_s6 + $0x74] sm:$0xf0]  ;;  %v1194_v19 = vld [vmem:[%s1586_s6 + $0x74] sm:$0xf]  ;;  %s467_s15 = scalar_lea.vmem %s1592_s12, %s1375_s19 }
  0x10   : > { %v470_v9 = vpack.c.bf16 %v469_v8, %v469_v8  ;;  %v1237_v10 = vld [vmem:[%s1583_s3] ss:$0 sm:$0xff]  ;;  %v1101_v20 = vor.u32 %v1195_v18, %v1100_v17  ;;  %v1102_v21 = vld [vmem:[%s1586_s6 + $0x78] sm:$0xf0]  ;;  %v1193_v34 = vld [vmem:[%s1586_s6 + $0x64] sm:$0xf0] }
  0x11   : > { %540 = vmatpush.bf16.msra.mxu0 %v1178_v1  ;;  %v468_v12 = vld [vmem:[%s460_s16] sm:$0xff]  ;;  %v1105_v22 = vor.u32 %v1194_v19, %v1102_v21  ;;  %v1094_v37 = vld [vmem:[%s1586_s6 + $0x68] sm:$0xf0]  ;;  %v1084_v39 = vld [vmem:[%s1586_s6 + $0x50] sm:$0xf] }
  0x12   : > { %693 = vmatpush.bf16.msra.mxu1 %v1101_v20  ;;  %v1092_v33 = vld [vmem:[%s1586_s6 + $0x60] sm:$0xf]  ;;  %v1192_v35 = vld [vmem:[%s1586_s6 + $0x64] sm:$0xf]  ;;  %v1191_v40 = vld [vmem:[%s1586_s6 + $0x54] sm:$0xf0] }
  0x13   : > { %v1244_v23 = vpop.eup %1243  ;;  %706 = vmatpush.bf16.msra.mxu2 %v1105_v22  ;;  %v1093_v36 = vor.u32 %v1193_v34, %v1092_v33  ;;  %v1097_v38 = vor.u32 %v1192_v35, %v1094_v37  ;;  %v1190_v41 = vld [vmem:[%s1586_s6 + $0x54] sm:$0xf]  ;;  %v1085_v42 = vor.u32 %v1191_v40, %v1084_v39  ;;  %v1086_v43 = vld [vmem:[%s1586_s6 + $0x58] sm:$0xf0]  ;;  %v1076_v45 = vld [vmem:[%s1586_s6 + $0x40] sm:$0xf] }
  0x14   : > { %v558_v24 = vmul.f32 128.0, %v1244_v23  ;;  %vm562_vm0 = vweird.f32 %v1244_v23  ;;  %v1089_v44 = vor.u32 %v1190_v41, %v1086_v43  ;;  %v1189_v46 = vld [vmem:[%s1586_s6 + $0x44] sm:$0xf0]  ;;  %v1188_v47 = vld [vmem:[%s1586_s6 + $0x44] sm:$0xf]  ;;  %v1210_v16 = vld [vmem:[%s1588_s8 + $0x70] sm:$0xff] }
  0x15   : > { %541 = vmatpush.bf16.msra.mxu0 %v1177_v2  ;;  %v1077_v48 = vor.u32 %v1189_v46, %v1076_v45  ;;  %v1078_v49 = vld [vmem:[%s1586_s6 + $0x48] sm:$0xf0]  ;;  %v1068_v51 = vld [vmem:[%s1586_s6 + $0x30] sm:$0xf]  ;;  %v1187_v52 = vld [vmem:[%s1586_s6 + $0x34] sm:$0xf0] }
  0x16   : > { %v559_v25 = vsub.f32 1.0, %v558_v24  ;;  %694 = vmatpush.bf16.msra.mxu1 %v1093_v36  ;;  %v1081_v50 = vor.u32 %v1188_v47, %v1078_v49  ;;  %v1186_v53 = vld [vmem:[%s1586_s6 + $0x34] sm:$0xf]  ;;  %v1069_v54 = vor.u32 %v1187_v52, %v1068_v51  ;;  %v1070_v55 = vld [vmem:[%s1586_s6 + $0x38] sm:$0xf0]  ;;  %v1201_v18 = vld [vmem:[%s1588_s8 + $0x28] sm:$0xff] }
  0x17   : > { %707 = vmatpush.bf16.msra.mxu2 %v1097_v38  ;;  %v1073_v56 = vor.u32 %v1186_v53, %v1070_v55  ;;  %v1060_v57 = vld [vmem:[%s1586_s6 + $0x20] sm:$0xf]  ;;  %v1185_v58 = vld [vmem:[%s1586_s6 + $0x24] sm:$0xf0]  ;;  %v1184_v59 = vld [vmem:[%s1586_s6 + $0x24] sm:$0xf] }
  0x18   : > { %v560_v26 = vmul.f32 %v1244_v23, %v559_v25  ;;  %v1061_v60 = vor.u32 %v1185_v58, %v1060_v57  ;;  %v1062_v61 = vld [vmem:[%s1586_s6 + $0x28] sm:$0xf0]  ;;  %v1052_v63 = vld [vmem:[%s1586_s6 + $0x10] sm:$0xf]  ;;  %v1183_v0 = vld [vmem:[%s1586_s6 + $0x14] sm:$0xf0] }
  0x19   : > { %542 = vmatpush.bf16.msra.mxu0 %v1176_v3  ;;  %v1065_v62 = vor.u32 %v1184_v59, %v1062_v61  ;;  %v1182_v1 = vld [vmem:[%s1586_s6 + $0x14] sm:$0xf]  ;;  %v1053_v2 = vor.u32 %v1183_v0, %v1052_v63  ;;  %v1054_v3 = vld [vmem:[%s1586_s6 + $0x18] sm:$0xf0]  ;;  %v1046_v8 = vld [vmem:[%s1586_s6 + $0x8] sm:$0xf0] }
  0x1a   : > { %v561_v27 = vadd.f32 %v1244_v23, %v560_v26  ;;  %695 = vmatpush.bf16.msra.mxu1 %v1085_v42  ;;  %v1209_v19 = vld [vmem:[%s1588_s8 + $0x68] sm:$0xff]  ;;  %v1200_v20 = vld [vmem:[%s1588_s8 + $0x20] sm:$0xff]  ;;  %v1199_v24 = vld [vmem:[%s1588_s8 + $0x18] sm:$0xff] }
  0x1b   : > { %708 = vmatpush.bf16.msra.mxu2 %v1089_v44  ;;  %v1208_v21 = vld [vmem:[%s1588_s8 + $0x60] sm:$0xff]  ;;  %v1207_v25 = vld [vmem:[%s1588_s8 + $0x58] sm:$0xff]  ;;  %v1197_v40 = vld [vmem:[%s1588_s8 + $0x8] sm:$0xff] }
  0x1c   : > { %v1406_v28 = vsel %vm562_vm0, %v1244_v23, %v561_v27  ;;  %v1238_v33 = vld [vmem:[%s1584_s4] ss:$0 sm:$0xff]  ;;  %v1206_v41 = vld [vmem:[%s1588_s8 + $0x50] sm:$0xff]  ;;  %v1205_v42 = vld [vmem:[%s1588_s8 + $0x48] sm:$0xff] }
  0x1d   : > { %543 = vmatpush.bf16.msra.mxu0 %v1175_v4  ;;  %v1044_v4 = vld [vmem:[%s1586_s6] sm:$0xf] }
  0x1e   : > { %696 = vmatpush.bf16.msra.mxu1 %v1077_v48  ;;  %v1239_v36 = vld [vmem:[%s1585_s5] ss:$0 sm:$0xff] }
  0x1f   : > { %709 = vmatpush.bf16.msra.mxu2 %v1081_v50  ;;  %v1204_v43 = vld [vmem:[%s1588_s8 + $0x40] sm:$0xff] }
  0x20   : > { %v607_v44 = vld [vmem:[%s1587_s7] sm:$0x3] }
  0x21   : > { %544 = vmatpush.bf16.msra.mxu0 %v1174_v5  ;;  %v1181_v5 = vld [vmem:[%s1586_s6 + $0x4] sm:$0xf0]  ;;  %v609_v45 = vperm.slane %v607_v44, 0  ;;  %v610_v49 = vperm.slane %v607_v44, 1  ;;  %v1240_v57 = vld [vmem:[%s1589_s9] ss:$0 sm:$0xff] }
  0x22   : > { %697 = vmatpush.bf16.msra.mxu1 %v1069_v54 }
  0x23   : > { %710 = vmatpush.bf16.msra.mxu2 %v1073_v56 }
  0x25   : > { %545 = vmatpush.bf16.msra.mxu0 %v1173_v6  ;;  %v1057_v6 = vor.u32 %v1182_v1, %v1054_v3 }
  0x26   : > { %698 = vmatpush.bf16.msra.mxu1 %v1061_v60 }
  0x27   : > { %711 = vmatpush.bf16.msra.mxu2 %v1065_v62 }
  0x29   : > { %546 = vmatpush.bf16.msra.mxu0 %v1172_v7  ;;  %v1180_v7 = vld [vmem:[%s1586_s6 + $0x4] sm:$0xf] }
  0x2a   : > { %699 = vmatpush.bf16.msra.mxu1 %v1053_v2 }
  0x2b   : > { %712 = vmatpush.bf16.msra.mxu2 %v1057_v6 }
  0x2c   : > { %547 = vmatmul.bf16.vlgmr.msra.gmra.mxu0 %v470_v9  ;;  %v1045_v9 = vor.u32 %v1181_v5, %v1044_v4 }
  0x2e   : > { %700 = vmatpush.bf16.msra.mxu1 %v1045_v9 }
  0xa9   : > { %v548_v11 = vpop.f32.mrf.mxu0 }
  0xaa   : > { %v549_v13 = vadd.f32 %v1237_v10, %v548_v11  ;;  %v1049_v10 = vor.u32 %v1180_v7, %v1046_v8  ;;  %v1203_v11 = vld [vmem:[%s1588_s8 + $0x38] sm:$0xff] }
  0xab   : > { %855 = vmatpush.bf16.msra.mxu3 %v1203_v11 }
  0xac   : > { %v552_v14 = vadd.f32 %v549_v13, %v468_v12  ;;  %713 = vmatpush.bf16.msra.mxu2 %v1049_v10  ;;  %v1211_v12 = vld [vmem:[%s1588_s8 + $0x78] sm:$0xff] }
  0xad   : > { %868 = vmatpush.bf16.msrb.mxu0 %v1211_v12 }
  0xae   : > { %555 = vadd.xlane.f32.xlu0 %v552_v14 }
  0xb1   : > { %v550_v15 = vpop.f32.mrf.mxu0  ;;  %869 = vmatpush.bf16.msrb.mxu0 %v1210_v16 }
  0xb2   : > { %v1202_v15 = vld [vmem:[%s1588_s8 + $0x30] sm:$0xff] }
  0xb3   : > { %856 = vmatpush.bf16.msra.mxu3 %v1202_v15 }
  0xb5   : > { %870 = vmatpush.bf16.msrb.mxu0 %v1209_v19 }
  0xb7   : > { %857 = vmatpush.bf16.msra.mxu3 %v1201_v18 }
  0xb9   : > { %871 = vmatpush.bf16.msrb.mxu0 %v1208_v21 }
  0xbb   : > { %858 = vmatpush.bf16.msra.mxu3 %v1200_v20 }
  0xbd   : > { %872 = vmatpush.bf16.msrb.mxu0 %v1207_v25 }
  0xbf   : > { %859 = vmatpush.bf16.msra.mxu3 %v1199_v24 }
  0xc1   : > { %873 = vmatpush.bf16.msrb.mxu0 %v1206_v41 }
  0xc5   : > { %874 = vmatpush.bf16.msrb.mxu0 %v1205_v42 }
  0xc9   : > { %875 = vmatpush.bf16.msrb.mxu0 %v1204_v43 }
 0x121   : > { %v556_v29 = vpop.xlane.xlu0 %555 }
 0x122   : > { %v564_v30 = vmul.f32 %v1406_v28, %v556_v29  ;;  %v1198_v29 = vld [vmem:[%s1588_s8 + $0x10] sm:$0xff] }
 0x123   : > { %860 = vmatpush.bf16.msra.mxu3 %v1198_v29 }
 0x124   : > { %v1409_v31 = vsub.f32 %v552_v14, %v564_v30 }
 0x126   : > { %v566_v32 = vmul.f32 %v1409_v31, %v1409_v31 }
 0x127   : > { %861 = vmatpush.bf16.msra.mxu3 %v1197_v40 }
 0x128   : > { %567 = vadd.xlane.f32.xlu0 %v566_v32 }
 0x19b   : > { %v568_v13 = vpop.xlane.xlu0 %567 }
 0x19c   : > { %v569_v14 = vmul.f32 %v568_v13, %v1406_v28 }
 0x19e   : > { %v570_v17 = vadd.f32 1e-05, %v569_v14  ;;  %v1241_v14 = vld [vmem:[%s1590_s10] ss:$0 sm:$0xff] }
 0x1a0   : > { %1245 = vrsqrt.f32 %v570_v17  ;;  %vm577_vm2 = vweird.f32 %v570_v17 }
 0x1a6   : > { %v1246_v22 = vpop.eup %1245 }
 0x1a7   : > { %v572_v23 = vmul.f32 %v1246_v22, %v570_v17  ;;  %vm578_vm1 = vweird.f32 %v1246_v22 }
 0x1a8   : > { %vm579_vm3 = vmor %vm577_vm2, %vm578_vm1 }
 0x1a9   : > { %v573_v26 = vmul.f32 %v1246_v22, %v572_v23 }
 0x1ab   : > { %v574_v27 = vmul.f32 0.5, %v573_v26 }
 0x1ad   : > { %v575_v30 = vsub.f32 1.5, %v574_v27 }
 0x1af   : > { %v576_v32 = vmul.f32 %v1246_v22, %v575_v30 }
 0x1b1   : > { %v580_v34 = vsel %vm579_vm3, %v1246_v22, %v576_v32 }
 0x1b2   : > { %v581_v35 = vmul.f32 %v580_v34, %v1409_v31  ;;  %v1196_v31 = vld [vmem:[%s1588_s8] sm:$0xff] }
 0x1b3   : > { %862 = vmatpush.bf16.msra.mxu3 %v1196_v31 }
 0x1b4   : > { %v585_v37 = vmul.f32 %v1238_v33, %v581_v35 }
 0x1b6   : > { %v589_v38 = vadd.f32 %v1239_v36, %v585_v37 }
 0x1b8   : > { %v590_v39 = vpack.c.bf16 %v589_v38, %v589_v38 }
 0x1ba   : > { %701 = vmatmul.bf16.vlgmr.msra.gmra.mxu1 %v590_v39  ;;  %714 = vmatmul.bf16.vlgmr.msra.gmra.mxu2 %v590_v39 }
 0x237   : > { %v702_v46 = vpop.f32.mrf.mxu1 }
 0x238   : > { %v703_v47 = vadd.f32 %v702_v46, %v609_v45 }
 0x23a   : > { %v719_v48 = vmax.f32 %v703_v47, 0.0 }
 0x23c   : > { %v721_v50 = vpack.c.bf16 %v719_v48, %v719_v48 }
 0x23d   : > { %v715_v51 = vpop.f32.mrf.mxu2 }
 0x23e   : > { %v716_v52 = vadd.f32 %v715_v51, %v610_v49  ;;  %863 = vmatmul.bf16.vlgmr.msra.gmra.mxu3 %v721_v50 }
 0x23f   : > { %v704_v53 = vpop.f32.mrf.mxu1 }
 0x240   : > { %v720_v54 = vmax.f32 %v716_v52, 0.0 }
 0x242   : > { %v722_v55 = vpack.c.bf16 %v720_v54, %v720_v54 }
 0x244   : > { %876 = vmatmul.bf16.vlgmr.msrb.gmra.mxu0 %v722_v55 }
 0x245   : > { %v717_v56 = vpop.f32.mrf.mxu2 }
 0x2c1   : > { %v864_v58 = vpop.f32.mrf.mxu3  ;;  %v877_v59 = vpop.f32.mrf.mxu0 }
 0x2c2   : > { %v865_v60 = vadd.f32 %v1240_v57, %v864_v58 }
 0x2c4   : > { %v878_v61 = vadd.f32 %v877_v59, %v865_v60 }
 0x2c6   : > { %v881_v62 = vadd.f32 %v878_v61, %v589_v38 }
 0x2c8   : > { %884 = vadd.xlane.f32.xlu1 %v881_v62 }
 0x2c9   : > { %v866_v63 = vpop.f32.mrf.mxu3  ;;  %v879_v0 = vpop.f32.mrf.mxu0 }
 0x33b   : > { %v885_v1 = vpop.xlane.xlu1 %884 }
 0x33c   : > { %v886_v2 = vmul.f32 %v885_v1, %v1406_v28 }
 0x33e   : > { %v887_v3 = vsub.f32 %v881_v62, %v886_v2 }
 0x340   : > { %v888_v4 = vmul.f32 %v887_v3, %v887_v3 }
 0x342   : > { %889 = vadd.xlane.f32.xlu1 %v888_v4 }
 0x3b5   : > { %v890_v5 = vpop.xlane.xlu1 %889 }
 0x3b6   : > { %v891_v6 = vmul.f32 %v890_v5, %v1406_v28  ;;  %v1242_v28 = vld [vmem:[%s1591_s11] ss:$0 sm:$0xff] }
 0x3b8   : > { %v892_v7 = vadd.f32 1e-05, %v891_v6 }
 0x3ba   : > { %1247 = vrsqrt.f32 %v892_v7  ;;  %vm899_vm5 = vweird.f32 %v892_v7 }
 0x3c0   : > { %v1248_v8 = vpop.eup %1247 }
 0x3c1   : > { %v894_v9 = vmul.f32 %v1248_v8, %v892_v7  ;;  %vm900_vm4 = vweird.f32 %v1248_v8 }
 0x3c2   : > { %vm901_vm6 = vmor %vm899_vm5, %vm900_vm4 }
 0x3c3   : > { %v895_v10 = vmul.f32 %v1248_v8, %v894_v9 }
 0x3c5   : > { %v896_v11 = vmul.f32 0.5, %v895_v10 }
 0x3c7   : > { %v897_v12 = vsub.f32 1.5, %v896_v11 }
 0x3c9   : > { %v898_v13 = vmul.f32 %v1248_v8, %v897_v12 }
 0x3cb   : > { %v902_v15 = vsel %vm901_vm6, %v1248_v8, %v898_v13 }
 0x3cc   : > { %v903_v16 = vmul.f32 %v902_v15, %v887_v3 }
 0x3ce   : > { %v907_v17 = vmul.f32 %v1241_v14, %v903_v16 }
 0x3d0   : > { %v911_v18 = vadd.f32 %v1242_v28, %v907_v17 }
 0x3d2   : > { %912 = vst [vmem:[%s467_s15] sm:$0xff] %v911_v18 }
 0x3d3 PF: > { %s22_s23 = sadd.s32 1, %s1271_s23   ;;  %s1593_s21 = smov %s1267_s22 }
 0x3d4   : > { %p19_p5 = scmp.ge.s32.totalorder %s22_s23, 4   ;;  %s1594_s22 = smov %s1596_s24 }
 0x3d6   :  { %21 = sbr.rel (!%p19_p5) target bundleno = 2 (0x2), region = 101 }

// kernel: _lambda_.11
= control target key start
LH: loop header
LB: loop body
LE: loop exit
PB: predicated region body
PF: predicated region fallthrough
CT: control target
= control target key end

     0   :  { %17 = vsyncpa [#allocation3], 0  ;;  %s1736_s0 = inlined_call_operand.vmem [shape: f32[2,8,128], index: 0, kind: input, shape index: {}]   ;;  %s1737_s1 = inlined_call_operand.vmem [shape: f32[2,8,128], index: 1, kind: input, shape index: {}]   ;;  %s1738_s2 = inlined_call_operand.vmem [shape: bf16[128,128], index: 2, kind: input, shape index: {}]   ;;  %s1739_s3 = inlined_call_operand.vmem [shape: f32[1,128], index: 3, kind: input, shape index: {}]   ;;  %s1740_s4 = inlined_call_operand.vmem [shape: f32[1,128], index: 4, kind: input, shape index: {}]   ;;  %s1741_s5 = inlined_call_operand.vmem [shape: f32[1,128], index: 5, kind: input, shape index: {}]   ;;  %s1742_s6 = inlined_call_operand.vmem [shape: bf16[128,256], index: 6, kind: input, shape index: {}]   ;;  %s1743_s7 = inlined_call_operand.vmem [shape: f32[1,256], index: 7, kind: input, shape index: {}]   ;;  %s1744_s8 = inlined_call_operand.vmem [shape: bf16[256,128], index: 8, kind: input, shape index: {}]   ;;  %s1745_s9 = inlined_call_operand.vmem [shape: f32[1,128], index: 9, kind: input, shape index: {}]   ;;  %s1746_s10 = inlined_call_operand.vmem [shape: f32[1,128], index: 10, kind: input, shape index: {}]   ;;  %s1747_s11 = inlined_call_operand.vmem [shape: f32[1,128], index: 11, kind: input, shape index: {}]   ;;  %s1748_s12 = inlined_call_operand.hbm [shape: f32[2,8,128], index: 12, kind: output, shape index: {}]  }
   0x1   :  { %19 = vsyncpa [#allocation3 + $0x1], 0  ;;  %s1436_s21 = smov 0   ;;  %s1438_s22 = smov 0  }
   0x2   :  { %s1440_s23 = smov 0   ;;  %s1442_s24 = smov 0  }
   0x3   :  { %s1444_s25 = smov 0   ;;  %s1446_s26 = smov 0  }
   0x4 LB: > { %1752 = sst [smem:[#allocation5_spill]] %s1356_s23  ;;  %s1010_s27 = sadd.s32 4294967295, %s1368_s26   ;;  %s1368_s26 = sphi %s1446_s26, %s25_s26   ;;  %s1364_s25 = sphi %s1444_s25, %s1764_s25   ;;  %s1360_s24 = sphi %s1442_s24, %s1760_s24   ;;  %s1356_s23 = sphi %s1440_s23, %s1759_s23   ;;  %s1352_s22 = sphi %s1438_s22, %s1763_s22   ;;  %s1348_s21 = sphi %s1436_s21, %s1762_s21  }
   0x5   : > { %1753 = sst [smem:[#allocation6_spill]] %s1364_s25  ;;  %s1011_s28 = sadd.s32 4294967294, %s1368_s26  }
   0x6   : > { %s37_s29 = sadd.s32 1, %s1364_s25  ;;  %s312_s30 = sadd.s32 1, %s1356_s23 }
   0x7   : > { %p39_p0 = scmp.ge.s32.totalorder %s37_s29, 2  ;;  %p322_p1 = scmp.ne.s32.totalorder %s1356_s23, %s1352_s22 }
   0x8   : > { %p323_p2 = scmp.eq.s32.totalorder %s1010_s27, 1  ;;  %p328_p3 = scmp.ne.s32.totalorder %s1352_s22, %s1348_s21 }
   0x9   : > { %s1766_s29 = smov (%p39_p0, %s37_s29), 0  ;;  %p329_p5 = scmp.eq.s32.totalorder %s1011_s28, 1 }
   0xa   : > { %1754 = sst [smem:[#allocation7_spill]] %s1766_s29  ;;  %p1476_p4 = por %p323_p2, %p322_p1 }
   0xb   : > { %s307_s14 = ssub.s32 %s1364_s25, %s1766_s29  ;;  %p1014_p6 = scmp.ge.s32.totalorder %s1368_s26, 1 }
   0xc   : > { %p310_p7 = scmp.eq.s32.totalorder %s307_s14, 0  ;;  %p1483_p8 = por %p329_p5, %p328_p3 }
   0xd   : > { %p397_p9 = scmp.lt.s32.totalorder %s1368_s26, 3 }
   0xe   : > { %s1489_s16 = scalar_select %p310_p7, %s1356_s23, %s312_s30  }
   0xf   : > { %p398_p10 = pnand %p1014_p6, %p397_p9 }
  0x10   : > { %1757 = sst [smem:[#allocation8_spill]] %s1489_s16  ;;  %p448_p11 = scmp.lt.s32.totalorder (!%p398_p10), %s1360_s24, 1 }
  0x11   : > { %401 = sbr.rel (%p398_p10) target bundleno = 991 (0x3df), region = 68  ;;  %s1179_s20 = sshll.u32 (!%p398_p10), %s1360_s24, 3 }
  0x12   : > { %s919_s30 = scalar_lea.hbm (!%p398_p10), %s1748_s12, %s1179_s20  ;;  %s1310_s14 = scalar_lea.hbm (!%p398_p10), %s1748_s12, 16 }
  0x13   : > { %s923_s18 = sshll.u32 (!%p398_p10), %s919_s30, 4  ;;  %s924_s18 = int_to_ptr.hbm [resolvable:$true] %s923_s18 }
  0x14   : > { %s1304_s23 = sshra.s32 (!%p398_p10), %s924_s18, 4  ;;  %s1305_s23 = int_to_ptr.hbm [resolvable:$true] %s1304_s23 }
  0x15   : > { %p1311_p1 = scmp.lt.s32.totalorder (!%p398_p10), %s1305_s23, %s1748_s12 }
  0x16   : > { %v1189_v0 = vld [vmem:[%s1738_s2 + $0x38] sm:$0xff]  ;;  %v1188_v1 = vld [vmem:[%s1738_s2 + $0x30] sm:$0xff]  ;;  %v1187_v2 = vld [vmem:[%s1738_s2 + $0x28] sm:$0xff]  ;;  %s449_s29 = scalar_select %p448_p11, %s1360_s24, 1  ;;  %v1370_v16 = vmov 128.0  }
  0x17   : > { %533 = vmatpush.bf16.msra.mxu0 %v1189_v0  ;;  %v1186_v3 = vld [vmem:[%s1738_s2 + $0x20] sm:$0xff]  ;;  %v1185_v4 = vld [vmem:[%s1738_s2 + $0x18] sm:$0xff]  ;;  %v1184_v5 = vld [vmem:[%s1738_s2 + $0x10] sm:$0xff]  ;;  %1284 = vrcp.f32 %v1370_v16 }
  0x18   : > { %s1016_s25 = sshll.u32 %s449_s29, 3  ;;  %v1183_v6 = vld [vmem:[%s1738_s2 + $0x8] sm:$0xff]  ;;  %v1182_v7 = vld [vmem:[%s1738_s2] sm:$0xff]  ;;  %v1108_v17 = vld [vmem:[%s1742_s6 + $0x70] sm:$0xf]  ;;  %s445_s29 = sand.u32 1, %s1352_s22  }
  0x19   : > { %s454_s16 = scalar_lea.vmem %s1736_s0, %s1016_s25  ;;  %v1278_v10 = vld [vmem:[%s1739_s3] ss:$0 sm:$0xff]  ;;  %s461_s27 = scalar_lea.vmem %s1737_s1, %s1016_s25  ;;  %v1205_v18 = vld [vmem:[%s1742_s6 + $0x74] sm:$0xf0]  ;;  %v1204_v19 = vld [vmem:[%s1742_s6 + $0x74] sm:$0xf] }
  0x1a   : > { %v463_v8 = vld [vmem:[%s454_s16] sm:$0xff]  ;;  %v1109_v20 = vor.u32 %v1205_v18, %v1108_v17  ;;  %v1110_v21 = vld [vmem:[%s1742_s6 + $0x78] sm:$0xf0]  ;;  %v1203_v34 = vld [vmem:[%s1742_s6 + $0x64] sm:$0xf0]  ;;  %s1015_s19 = sshll.u32 %s445_s29, 3 }
  0x1b   : > { %534 = vmatpush.bf16.msra.mxu0 %v1188_v1  ;;  %v464_v9 = vpack.c.bf16 %v463_v8, %v463_v8  ;;  %v462_v12 = vld [vmem:[%s461_s27] sm:$0xff]  ;;  %v1113_v22 = vor.u32 %v1204_v19, %v1110_v21  ;;  %v1102_v37 = vld [vmem:[%s1742_s6 + $0x68] sm:$0xf0]  ;;  %v1092_v39 = vld [vmem:[%s1742_s6 + $0x50] sm:$0xf]  ;;  %s447_s25 = scalar_lea.vmem [#allocation2], %s1015_s19 }
  0x1c   : > { %687 = vmatpush.bf16.msra.mxu1 %v1109_v20  ;;  %v1100_v33 = vld [vmem:[%s1742_s6 + $0x60] sm:$0xf]  ;;  %v1202_v35 = vld [vmem:[%s1742_s6 + $0x64] sm:$0xf]  ;;  %v1201_v40 = vld [vmem:[%s1742_s6 + $0x54] sm:$0xf0] }
  0x1d   : > { %v1285_v23 = vpop.eup %1284  ;;  %700 = vmatpush.bf16.msra.mxu2 %v1113_v22  ;;  %v1101_v36 = vor.u32 %v1203_v34, %v1100_v33  ;;  %v1105_v38 = vor.u32 %v1202_v35, %v1102_v37  ;;  %v1200_v41 = vld [vmem:[%s1742_s6 + $0x54] sm:$0xf]  ;;  %v1093_v42 = vor.u32 %v1201_v40, %v1092_v39  ;;  %v1094_v43 = vld [vmem:[%s1742_s6 + $0x58] sm:$0xf0]  ;;  %v1084_v45 = vld [vmem:[%s1742_s6 + $0x40] sm:$0xf] }
  0x1e   : > { %v552_v24 = vmul.f32 128.0, %v1285_v23  ;;  %vm556_vm0 = vweird.f32 %v1285_v23  ;;  %v1097_v44 = vor.u32 %v1200_v41, %v1094_v43  ;;  %v1199_v46 = vld [vmem:[%s1742_s6 + $0x44] sm:$0xf0]  ;;  %v1198_v47 = vld [vmem:[%s1742_s6 + $0x44] sm:$0xf]  ;;  %v1220_v16 = vld [vmem:[%s1744_s8 + $0x70] sm:$0xff] }
  0x1f   : > { %535 = vmatpush.bf16.msra.mxu0 %v1187_v2  ;;  %v1085_v48 = vor.u32 %v1199_v46, %v1084_v45  ;;  %v1086_v49 = vld [vmem:[%s1742_s6 + $0x48] sm:$0xf0]  ;;  %v1076_v51 = vld [vmem:[%s1742_s6 + $0x30] sm:$0xf]  ;;  %v1197_v52 = vld [vmem:[%s1742_s6 + $0x34] sm:$0xf0] }
  0x20   : > { %v553_v25 = vsub.f32 1.0, %v552_v24  ;;  %688 = vmatpush.bf16.msra.mxu1 %v1101_v36  ;;  %v1089_v50 = vor.u32 %v1198_v47, %v1086_v49  ;;  %v1196_v53 = vld [vmem:[%s1742_s6 + $0x34] sm:$0xf]  ;;  %v1077_v54 = vor.u32 %v1197_v52, %v1076_v51  ;;  %v1078_v55 = vld [vmem:[%s1742_s6 + $0x38] sm:$0xf0]  ;;  %v1211_v18 = vld [vmem:[%s1744_s8 + $0x28] sm:$0xff] }
  0x21   : > { %701 = vmatpush.bf16.msra.mxu2 %v1105_v38  ;;  %v1081_v56 = vor.u32 %v1196_v53, %v1078_v55  ;;  %v1068_v57 = vld [vmem:[%s1742_s6 + $0x20] sm:$0xf]  ;;  %v1195_v58 = vld [vmem:[%s1742_s6 + $0x24] sm:$0xf0]  ;;  %v1194_v59 = vld [vmem:[%s1742_s6 + $0x24] sm:$0xf] }
  0x22   : > { %v554_v26 = vmul.f32 %v1285_v23, %v553_v25  ;;  %v1069_v60 = vor.u32 %v1195_v58, %v1068_v57  ;;  %v1070_v61 = vld [vmem:[%s1742_s6 + $0x28] sm:$0xf0]  ;;  %v1060_v63 = vld [vmem:[%s1742_s6 + $0x10] sm:$0xf]  ;;  %v1193_v0 = vld [vmem:[%s1742_s6 + $0x14] sm:$0xf0] }
  0x23   : > { %536 = vmatpush.bf16.msra.mxu0 %v1186_v3  ;;  %v1073_v62 = vor.u32 %v1194_v59, %v1070_v61  ;;  %v1192_v1 = vld [vmem:[%s1742_s6 + $0x14] sm:$0xf]  ;;  %v1061_v2 = vor.u32 %v1193_v0, %v1060_v63  ;;  %v1062_v3 = vld [vmem:[%s1742_s6 + $0x18] sm:$0xf0]  ;;  %v1054_v8 = vld [vmem:[%s1742_s6 + $0x8] sm:$0xf0] }
  0x24   : > { %v555_v27 = vadd.f32 %v1285_v23, %v554_v26  ;;  %689 = vmatpush.bf16.msra.mxu1 %v1093_v42  ;;  %v1219_v19 = vld [vmem:[%s1744_s8 + $0x68] sm:$0xff]  ;;  %v1210_v20 = vld [vmem:[%s1744_s8 + $0x20] sm:$0xff]  ;;  %v1209_v24 = vld [vmem:[%s1744_s8 + $0x18] sm:$0xff]  ;;  %s921_s24 = sshll.u32 %s447_s25, 4  ;;  %s908_s27 = scalar_lea.sflag [#allocation3], %s445_s29  ;;  %s922_s24 = int_to_ptr.vmem [resolvable:$true] %s921_s24 }
  0x25   : > { %702 = vmatpush.bf16.msra.mxu2 %v1097_v44  ;;  %v1218_v21 = vld [vmem:[%s1744_s8 + $0x60] sm:$0xff]  ;;  %v1217_v25 = vld [vmem:[%s1744_s8 + $0x58] sm:$0xff]  ;;  %v1207_v40 = vld [vmem:[%s1744_s8 + $0x8] sm:$0xff]  ;;  %s1306_s16 = scalar_lea.hbm %s1305_s23, 8 }
  0x26   : > { %v1538_v28 = vsel %vm556_vm0, %v1285_v23, %v555_v27  ;;  %v1279_v33 = vld [vmem:[%s1740_s4] ss:$0 sm:$0xff]  ;;  %v1216_v41 = vld [vmem:[%s1744_s8 + $0x50] sm:$0xff]  ;;  %v1215_v42 = vld [vmem:[%s1744_s8 + $0x48] sm:$0xff]  ;;  %p1307_p12 = scmp.ne.s32.totalorder %s1305_s23, %s1306_s16  ;;  %p1312_p2 = scmp.lt.s32.totalorder %s1310_s14, %s1306_s16 }
  0x27   : > { %537 = vmatpush.bf16.msra.mxu0 %v1185_v4  ;;  %v1052_v4 = vld [vmem:[%s1742_s6] sm:$0xf] }
  0x28   : > { %690 = vmatpush.bf16.msra.mxu1 %v1085_v48  ;;  %v1280_v36 = vld [vmem:[%s1741_s5] ss:$0 sm:$0xff]  ;;  %p1308_p13 = pnand %p1307_p12, %p1476_p4  ;;  %p1313_p3 = por %p1312_p2, %p1311_p1 }
  0x29   : > { %703 = vmatpush.bf16.msra.mxu2 %v1089_v50  ;;  %v1214_v43 = vld [vmem:[%s1744_s8 + $0x40] sm:$0xff] }
  0x2a   : > { %v601_v44 = vld [vmem:[%s1743_s7] sm:$0x3]  ;;  %p1309_p0 = pneg %p1308_p13 }
  0x2b   : > { %538 = vmatpush.bf16.msra.mxu0 %v1184_v5  ;;  %v1191_v5 = vld [vmem:[%s1742_s6 + $0x4] sm:$0xf0]  ;;  %v603_v45 = vperm.slane %v601_v44, 0  ;;  %v604_v49 = vperm.slane %v601_v44, 1  ;;  %v1281_v57 = vld [vmem:[%s1745_s9] ss:$0 sm:$0xff] }
  0x2c   : > { %691 = vmatpush.bf16.msra.mxu1 %v1077_v54  ;;  %p1314_p5 = pnand %p1313_p3, %p1309_p0 }
  0x2d   : > { %704 = vmatpush.bf16.msra.mxu2 %v1081_v56 }
  0x2f   : > { %539 = vmatpush.bf16.msra.mxu0 %v1183_v6  ;;  %v1065_v6 = vor.u32 %v1192_v1, %v1062_v3 }
  0x30   : > { %692 = vmatpush.bf16.msra.mxu1 %v1069_v60 }
  0x31   : > { %705 = vmatpush.bf16.msra.mxu2 %v1073_v62 }
  0x33   : > { %540 = vmatpush.bf16.msra.mxu0 %v1182_v7  ;;  %v1190_v7 = vld [vmem:[%s1742_s6 + $0x4] sm:$0xf] }
  0x34   : > { %693 = vmatpush.bf16.msra.mxu1 %v1061_v2 }
  0x35   : > { %706 = vmatpush.bf16.msra.mxu2 %v1065_v6 }
  0x36   : > { %541 = vmatmul.bf16.vlgmr.msra.gmra.mxu0 %v464_v9  ;;  %v1053_v9 = vor.u32 %v1191_v5, %v1052_v4 }
  0x38   : > { %694 = vmatpush.bf16.msra.mxu1 %v1053_v9 }
  0xb3   : > { %v542_v11 = vpop.f32.mrf.mxu0 }
  0xb4   : > { %v543_v13 = vadd.f32 %v1278_v10, %v542_v11  ;;  %v1057_v10 = vor.u32 %v1190_v7, %v1054_v8  ;;  %v1213_v11 = vld [vmem:[%s1744_s8 + $0x38] sm:$0xff] }
  0xb5   : > { %849 = vmatpush.bf16.msra.mxu3 %v1213_v11 }
  0xb6   : > { %v546_v14 = vadd.f32 %v543_v13, %v462_v12  ;;  %707 = vmatpush.bf16.msra.mxu2 %v1057_v10  ;;  %v1221_v12 = vld [vmem:[%s1744_s8 + $0x78] sm:$0xff] }
  0xb7   : > { %862 = vmatpush.bf16.msrb.mxu0 %v1221_v12 }
  0xb8   : > { %549 = vadd.xlane.f32.xlu0 %v546_v14 }
  0xbb   : > { %v544_v15 = vpop.f32.mrf.mxu0  ;;  %863 = vmatpush.bf16.msrb.mxu0 %v1220_v16  ;;  %v1283_v16 = vld [vmem:[%s1747_s11] ss:$0 sm:$0xff] }
  0xbc   : > { %v1212_v15 = vld [vmem:[%s1744_s8 + $0x30] sm:$0xff] }
  0xbd   : > { %850 = vmatpush.bf16.msra.mxu3 %v1212_v15 }
  0xbf   : > { %864 = vmatpush.bf16.msrb.mxu0 %v1219_v19 }
  0xc1   : > { %851 = vmatpush.bf16.msra.mxu3 %v1211_v18 }
  0xc3   : > { %865 = vmatpush.bf16.msrb.mxu0 %v1218_v21 }
  0xc5   : > { %852 = vmatpush.bf16.msra.mxu3 %v1210_v20 }
  0xc7   : > { %866 = vmatpush.bf16.msrb.mxu0 %v1217_v25 }
  0xc9   : > { %853 = vmatpush.bf16.msra.mxu3 %v1209_v24 }
  0xcb   : > { %867 = vmatpush.bf16.msrb.mxu0 %v1216_v41 }
  0xcf   : > { %868 = vmatpush.bf16.msrb.mxu0 %v1215_v42 }
  0xd3   : > { %869 = vmatpush.bf16.msrb.mxu0 %v1214_v43 }
 0x12b   : > { %v550_v29 = vpop.xlane.xlu0 %549 }
 0x12c   : > { %v558_v30 = vmul.f32 %v1538_v28, %v550_v29  ;;  %v1208_v29 = vld [vmem:[%s1744_s8 + $0x10] sm:$0xff] }
 0x12d   : > { %854 = vmatpush.bf16.msra.mxu3 %v1208_v29 }
 0x12e   : > { %v1541_v31 = vsub.f32 %v546_v14, %v558_v30 }
 0x130   : > { %v560_v32 = vmul.f32 %v1541_v31, %v1541_v31 }
 0x131   : > { %855 = vmatpush.bf16.msra.mxu3 %v1207_v40 }
 0x132   : > { %561 = vadd.xlane.f32.xlu0 %v560_v32 }
 0x1a5   : > { %v562_v13 = vpop.xlane.xlu0 %561 }
 0x1a6   : > { %v563_v14 = vmul.f32 %v562_v13, %v1538_v28 }
 0x1a8   : > { %v564_v17 = vadd.f32 1e-05, %v563_v14  ;;  %v1282_v14 = vld [vmem:[%s1746_s10] ss:$0 sm:$0xff] }
 0x1aa   : > { %1286 = vrsqrt.f32 %v564_v17  ;;  %vm571_vm2 = vweird.f32 %v564_v17 }
 0x1b0   : > { %v1287_v22 = vpop.eup %1286 }
 0x1b1   : > { %v566_v23 = vmul.f32 %v1287_v22, %v564_v17  ;;  %vm572_vm1 = vweird.f32 %v1287_v22 }
 0x1b2   : > { %vm573_vm3 = vmor %vm571_vm2, %vm572_vm1 }
 0x1b3   : > { %v567_v26 = vmul.f32 %v1287_v22, %v566_v23 }
 0x1b5   : > { %v568_v27 = vmul.f32 0.5, %v567_v26 }
 0x1b7   : > { %v569_v30 = vsub.f32 1.5, %v568_v27 }
 0x1b9   : > { %v570_v32 = vmul.f32 %v1287_v22, %v569_v30 }
 0x1bb   : > { %v574_v34 = vsel %vm573_vm3, %v1287_v22, %v570_v32 }
 0x1bc   : > { %v575_v35 = vmul.f32 %v574_v34, %v1541_v31  ;;  %v1206_v31 = vld [vmem:[%s1744_s8] sm:$0xff] }
 0x1bd   : > { %856 = vmatpush.bf16.msra.mxu3 %v1206_v31 }
 0x1be   : > { %v579_v37 = vmul.f32 %v1279_v33, %v575_v35 }
 0x1c0   : > { %v583_v38 = vadd.f32 %v1280_v36, %v579_v37 }
 0x1c2   : > { %v584_v39 = vpack.c.bf16 %v583_v38, %v583_v38 }
 0x1c4   : > { %695 = vmatmul.bf16.vlgmr.msra.gmra.mxu1 %v584_v39  ;;  %708 = vmatmul.bf16.vlgmr.msra.gmra.mxu2 %v584_v39 }
 0x241   : > { %v696_v46 = vpop.f32.mrf.mxu1 }
 0x242   : > { %v697_v47 = vadd.f32 %v696_v46, %v603_v45 }
 0x244   : > { %v713_v48 = vmax.f32 %v697_v47, 0.0 }
 0x246   : > { %v715_v50 = vpack.c.bf16 %v713_v48, %v713_v48 }
 0x247   : > { %v709_v51 = vpop.f32.mrf.mxu2 }
 0x248   : > { %v710_v52 = vadd.f32 %v709_v51, %v604_v49  ;;  %857 = vmatmul.bf16.vlgmr.msra.gmra.mxu3 %v715_v50 }
 0x249   : > { %v698_v53 = vpop.f32.mrf.mxu1 }
 0x24a   : > { %v714_v54 = vmax.f32 %v710_v52, 0.0 }
 0x24c   : > { %v716_v55 = vpack.c.bf16 %v714_v54, %v714_v54 }
 0x24e   : > { %870 = vmatmul.bf16.vlgmr.msrb.gmra.mxu0 %v716_v55 }
 0x24f   : > { %v711_v56 = vpop.f32.mrf.mxu2 }
 0x2cb   : > { %v858_v58 = vpop.f32.mrf.mxu3  ;;  %v871_v59 = vpop.f32.mrf.mxu0 }
 0x2cc   : > { %v859_v60 = vadd.f32 %v1281_v57, %v858_v58 }
 0x2ce   : > { %v872_v61 = vadd.f32 %v871_v59, %v859_v60 }
 0x2d0   : > { %v875_v62 = vadd.f32 %v872_v61, %v583_v38 }
 0x2d2   : > { %878 = vadd.xlane.f32.xlu1 %v875_v62 }
 0x2d3   : > { %v860_v63 = vpop.f32.mrf.mxu3  ;;  %v873_v0 = vpop.f32.mrf.mxu0 }
 0x345   : > { %v879_v1 = vpop.xlane.xlu1 %878 }
 0x346   : > { %v880_v2 = vmul.f32 %v879_v1, %v1538_v28 }
 0x348   : > { %v881_v3 = vsub.f32 %v875_v62, %v880_v2 }
 0x34a   : > { %v882_v4 = vmul.f32 %v881_v3, %v881_v3 }
 0x34c   : > { %883 = vadd.xlane.f32.xlu1 %v882_v4 }
 0x3bf   : > { %v884_v5 = vpop.xlane.xlu1 %883 }
 0x3c0   : > { %v885_v6 = vmul.f32 %v884_v5, %v1538_v28 }
 0x3c2   : > { %v886_v7 = vadd.f32 1e-05, %v885_v6 }
 0x3c4   : > { %1288 = vrsqrt.f32 %v886_v7  ;;  %vm893_vm5 = vweird.f32 %v886_v7 }
 0x3ca   : > { %v1289_v8 = vpop.eup %1288 }
 0x3cb   : > { %v888_v9 = vmul.f32 %v1289_v8, %v886_v7  ;;  %vm894_vm4 = vweird.f32 %v1289_v8 }
 0x3cc   : > { %vm895_vm6 = vmor %vm893_vm5, %vm894_vm4 }
 0x3cd   : > { %v889_v10 = vmul.f32 %v1289_v8, %v888_v9 }
 0x3cf   : > { %v890_v11 = vmul.f32 0.5, %v889_v10 }
 0x3d1   : > { %v891_v12 = vsub.f32 1.5, %v890_v11 }
 0x3d3   : > { %v892_v13 = vmul.f32 %v1289_v8, %v891_v12 }
 0x3d5   : > { %v896_v28 = vsel %vm895_vm6, %v1289_v8, %v892_v13 }
 0x3d6   : > { %v897_v15 = vmul.f32 %v896_v28, %v881_v3 }
 0x3d8   : > { %v901_v17 = vmul.f32 %v1282_v14, %v897_v15 }
 0x3da   : > { %v905_v18 = vadd.f32 %v1283_v16, %v901_v17 }
 0x3dc   : > { %906 = vst [vmem:[%s447_s25] sm:$0xff] %v905_v18 }
 0x3dd   : > { %1317 = shalt.err (!%p1314_p5)
}
 0x3de   : > { %1222 = dma.vmem_to_hbm [thread:$0]  (%p1476_p4), %s922_s24, 128, %s924_s18, %s908_s27  }
 0x3df PF: > { %p1228_p6 = scmp.ge.s32.totalorder %s1368_s26, 2  ;;  %s935_s29 = sand.u32 1, %s1348_s21  }
 0x3e0   : > { %s936_s30 = scalar_lea.sflag [#allocation3], %s935_s29 }
 0x3e1   : > { %p1225_p7 = pnand %p1228_p6, %p1483_p8 }
 0x3e3   : > { %p1226_p9 = pneg %p1225_p7 }
 0x3e5   : > { %1343 = dma.done.wait (%p1226_p9), %s936_s30, 128  }
 0x3e6   : > { %1345 = vsyncadd (%p1226_p9), %s936_s30, 4294967168  ;;  %s25_s26 = sadd.s32 1, %s1368_s26   ;;  %s1758_s25 = sld [smem:[#allocation5_spill]] }
 0x3e7   : > { %p22_p10 = scmp.ge.s32.totalorder %s25_s26, 4   ;;  %s1759_s23 = sld [smem:[#allocation8_spill]] }
 0x3e8   : > { %s1760_s24 = sld [smem:[#allocation6_spill]]  ;;  %s1762_s21 = smov %s1352_s22 }
 0x3e9   : > { %s1761_s13 = sld [smem:[#allocation7_spill]] }
 0x3eb   :  { %24 = sbr.rel (!%p22_p10) target bundleno = 4 (0x4), region = 106 }
 0x3ec   : > { %s1763_s22 = smov %s1758_s25 }
 0x3ef   : > { %s1764_s25 = smov %s1761_s13 }
 0x3f0   :  { %942 = vsyncpa [#allocation3], 1 }
 0x3f1   :  { %944 = vsyncpa [#allocation3 + $0x1], 1 }

</bundles_post_ra>
